<compile_context>
chip_gen: v7x
topology: tpu7x:2x2x1
jax: 0.10.0
libtpu: 0.0.40
codegen_flags: <defaults>
</compile_context>

<pallas_src>
import math

import jax
import jax.numpy as jnp
import numpy as np
from jax.experimental import pallas as pl
from jax.experimental.pallas import tpu as pltpu

STATE_SIZE = 32          # module spec: state_size = 32
ACTION_SIZE = 45         # module spec: action_size = 45
HIDDEN = 256             # nn.Module default hidden_size=256 (128-lane multiple)
H2 = HIDDEN // 2         # 128 -> exactly one vreg lane width
OUT_PAD = 128            # lane-dense head output: [A(45) | V | zeros]
V_LANE = ACTION_SIZE     # lane 45 carries V(s); lanes 0..44 carry A(s,a)
MAX_TILE_B = 512         # cap per grid step (working set stays << scoped VMEM)


def _round_up(n, m):
    return ((n + m - 1) // m) * m


def _dqn_kernel(x_ref,
                w1_ref, b1_ref, w2_ref, b2_ref,
                wh1_ref, bh1_ref, wh2_ref, bh2_ref, wh3_ref, bh3_ref,
                q_ref):
    """Dueling-DQN forward for one (tile_b, STATE_SIZE) batch tile."""

    def dense(x_bf16, w_ref, b_ref):
        # bf16 operands on the MXU, f32 accumulation; bias/ReLU epilogue in
        # bf16 (native on v6e/v7x VALUs; still correct on v5e).
        acc = jnp.dot(x_bf16, w_ref[...], preferred_element_type=jnp.float32)
        return jnp.maximum(acc.astype(jnp.bfloat16) + b_ref[...], 0)

    x = x_ref[...].astype(jnp.bfloat16)

    # feature_layer: Linear -> ReLU -> Linear -> ReLU -> Dropout(0.1)
    h = dense(x, w1_ref, b1_ref)
    h = dense(h, w2_ref, b2_ref)
    # TODO(synk): nn.Dropout(0.1) is treated as eval-mode identity (no train-time RNG drop).

    # fused value||advantage streams (3 matmuls instead of 6):
    s1 = dense(h, wh1_ref, bh1_ref)                # (TB, 2H)   = [a1 | v1]
    s2 = dense(s1, wh2_ref, bh2_ref)               # (TB, 2*H2) = [a2 | v2] (block-diag)
    # head layer: no ReLU; f32 epilogue for the dueling combine.
    va = jnp.dot(s2, wh3_ref[...],
                 preferred_element_type=jnp.float32) + bh3_ref[...]   # (TB, 128)

    # Dueling combine.  Pad lanes 46..127 of va are structurally exact zeros
    # (zero weight columns, zero bias, no ReLU on this layer) and lane 45 is
    # V, so mean(A) = (sum(va) - V) / 45 -- no iota / compare / select needed.
    v = va[:, V_LANE:V_LANE + 1]                                       # (TB, 1)
    a_mean = (jnp.sum(va, axis=1, keepdims=True) - v) * (1.0 / ACTION_SIZE)

    # lane-dense (TB, 128) store; lanes 0..44 hold Q(s,a), the rest don't-care.
    q_ref[...] = v + (va - a_mean)


def yahtzee_dqn_forward(state, fused, *, max_tile_b=MAX_TILE_B):
    """state: (B, STATE_SIZE) f32, any B (ragged batches padded internally).
    Returns (B, ACTION_SIZE) f32 Q-values."""
    batch = state.shape[0]

    # Adaptive batch tiling: one grid step when the whole batch fits
    # (dominant win for this tiny MLP -- ~0.35 us fixed cost per grid step --
    # and optimal on single-TC v5e/v6e); otherwise tiles of max_tile_b rows
    # with the batch axis "parallel" so v7x can shard across its two TCs.
    tile_b = min(_round_up(batch, 8), max_tile_b)
    padded = _round_up(batch, tile_b)
    x = state if padded == batch else jnp.pad(state, ((0, padded - batch), (0, 0)))
    grid = (padded // tile_b,)

    args = (x,
            fused["w1"], fused["b1"], fused["w2"], fused["b2"],
            fused["wh1"], fused["bh1"], fused["wh2"], fused["bh2"],
            fused["wh3"], fused["bh3"])

    def resident(arr):
        # full-array block + constant index map -> same block index every grid
        # step, so the weight is not re-fetched and stays VMEM-resident.
        return pl.BlockSpec(arr.shape, lambda i: (0, 0))

    in_specs = [pl.BlockSpec((tile_b, STATE_SIZE), lambda i: (i, 0))]
    in_specs += [resident(a) for a in args[1:]]

    # Advisory cost estimate for XLA's scheduler around this small custom call.
    flops = 2 * padded * (STATE_SIZE * HIDDEN + HIDDEN * HIDDEN
                          + HIDDEN * 2 * HIDDEN + 2 * HIDDEN * 2 * H2
                          + 2 * H2 * OUT_PAD)
    bytes_accessed = int(sum(int(np.prod(a.shape)) * a.dtype.itemsize for a in args)
                         + padded * OUT_PAD * 4)
    cost = pl.CostEstimate(flops=int(flops), transcendentals=0,
                           bytes_accessed=bytes_accessed)

    q_pad = pl.pallas_call(
        _dqn_kernel,
        out_shape=jax.ShapeDtypeStruct((padded, OUT_PAD), jnp.float32),
        grid=grid,
        in_specs=in_specs,
        out_specs=pl.BlockSpec((tile_b, OUT_PAD), lambda i: (i, 0)),
        compiler_params=pltpu.CompilerParams(
            dimension_semantics=("parallel",)),   # megacore split on v7x; no-op on v5e/v6e
        cost_estimate=cost,
    )(*args)

    # Q lives in the leading contiguous lanes -> cheap leading-range slice.
    return q_pad[:batch, :ACTION_SIZE]


def _init_linear(key, fan_in, fan_out):
    """PyTorch-default-style init: U(-1/sqrt(fan_in), 1/sqrt(fan_in))."""
    kw, kb = jax.random.split(key)
    bound = 1.0 / math.sqrt(fan_in)
    w = jax.random.uniform(kw, (fan_in, fan_out), jnp.float32, -bound, bound)
    b = jax.random.uniform(kb, (1, fan_out), jnp.float32, -bound, bound)
    return w, b


def make_params(key):
    """Raw per-layer f32 parameters matching the PyTorch module layout."""
    keys = jax.random.split(key, 8)
    p = {}
    p["w1"], p["b1"] = _init_linear(keys[0], STATE_SIZE, HIDDEN)
    p["w2"], p["b2"] = _init_linear(keys[1], HIDDEN, HIDDEN)
    p["wv1"], p["bv1"] = _init_linear(keys[2], HIDDEN, HIDDEN)
    p["wv2"], p["bv2"] = _init_linear(keys[3], HIDDEN, H2)
    p["wv3"], p["bv3"] = _init_linear(keys[4], H2, 1)
    p["wa1"], p["ba1"] = _init_linear(keys[5], HIDDEN, HIDDEN)
    p["wa2"], p["ba2"] = _init_linear(keys[6], HIDDEN, H2)
    p["wa3"], p["ba3"] = _init_linear(keys[7], H2, ACTION_SIZE)
    return p


def fuse_params(p):
    """Fuse value/advantage streams + pad the head output lane-dense.

    INVARIANT (relied on by the kernel's sum-minus-V mean): columns 46..127 of
    wh3 and bh3 are EXACT zeros, and lane 45 holds the value head."""
    f = {}
    f["w1"] = p["w1"].astype(jnp.bfloat16)
    f["b1"] = p["b1"].astype(jnp.bfloat16)
    f["w2"] = p["w2"].astype(jnp.bfloat16)
    f["b2"] = p["b2"].astype(jnp.bfloat16)

    # stream layer 1: concat -> one (H, 2H) matmul producing [a1 | v1]
    f["wh1"] = jnp.concatenate([p["wa1"], p["wv1"]], axis=1).astype(jnp.bfloat16)
    f["bh1"] = jnp.concatenate([p["ba1"], p["bv1"]], axis=1).astype(jnp.bfloat16)

    # stream layer 2: block-diagonal (2H, 2*H2) -> [a2 | v2].
    # NOTE (v5e-only option from the review): on the 128-wide MXU this fused
    # form costs ~2x the tile passes of two split (256,128) matmuls; keep it
    # fused here because it is free on v6e/v7x's 256-wide MXUs.
    wh2 = jnp.zeros((2 * HIDDEN, 2 * H2), jnp.float32)
    wh2 = wh2.at[:HIDDEN, :H2].set(p["wa2"])
    wh2 = wh2.at[HIDDEN:, H2:].set(p["wv2"])
    f["wh2"] = wh2.astype(jnp.bfloat16)
    f["bh2"] = jnp.concatenate([p["ba2"], p["bv2"]], axis=1).astype(jnp.bfloat16)

    # stream layer 3: block-diagonal, padded lane-dense to OUT_PAD columns.
    # columns 0..44 <- advantage head, column 45 <- value head, 46..127 zeros.
    wh3 = jnp.zeros((2 * H2, OUT_PAD), jnp.float32)
    wh3 = wh3.at[:H2, 0:ACTION_SIZE].set(p["wa3"])
    wh3 = wh3.at[H2:, V_LANE:V_LANE + 1].set(p["wv3"])
    f["wh3"] = wh3.astype(jnp.bfloat16)

    bh3 = jnp.zeros((1, OUT_PAD), jnp.float32)
    bh3 = bh3.at[:, 0:ACTION_SIZE].set(p["ba3"])
    bh3 = bh3.at[:, V_LANE:V_LANE + 1].set(p["bv3"])
    f["bh3"] = bh3
    return f


def reference_forward(state, p):
    """Pure-JAX f32 reference (unfused, matches the PyTorch forward)."""
    relu = lambda x: jnp.maximum(x, 0.0)
    h = relu(state @ p["w1"] + p["b1"])
    h = relu(h @ p["w2"] + p["b2"])
    v = relu(h @ p["wv1"] + p["bv1"])
    v = relu(v @ p["wv2"] + p["bv2"])
    v = v @ p["wv3"] + p["bv3"]
    a = relu(h @ p["wa1"] + p["ba1"])
    a = relu(a @ p["wa2"] + p["ba2"])
    a = a @ p["wa3"] + p["ba3"]
    return v + (a - jnp.mean(a, axis=1, keepdims=True))


if __name__ == "__main__":
    batch = 130  # small, deliberately ragged: exercises the internal pad path

    key = jax.random.PRNGKey(0)
    key_params, key_state = jax.random.split(key)

    params = make_params(key_params)
    fused = fuse_params(params)
    state = jax.random.normal(key_state, (batch, STATE_SIZE), jnp.float32)

    q = jax.block_until_ready(yahtzee_dqn_forward(state, fused))
    q_ref = jax.block_until_ready(reference_forward(state, params))

    assert q.shape == (batch, ACTION_SIZE)
    # bf16 matmul operands / epilogue -> relaxed tolerance vs the f32 reference.
    np.testing.assert_allclose(np.asarray(q), np.asarray(q_ref), rtol=3e-2, atol=3e-2)

    print("KERNEL_OK")
</pallas_src>

<mosaic_0001>
module attributes {stable_mosaic.version = 11 : i64} {
  func.func @_dqn_kernel(%arg0: i32, %arg1: memref<136x32xf32, #tpu.memory_space<vmem>>, %arg2: memref<32x256xbf16, #tpu.memory_space<vmem>>, %arg3: memref<1x256xbf16, #tpu.memory_space<vmem>>, %arg4: memref<256x256xbf16, #tpu.memory_space<vmem>>, %arg5: memref<1x256xbf16, #tpu.memory_space<vmem>>, %arg6: memref<256x512xbf16, #tpu.memory_space<vmem>>, %arg7: memref<1x512xbf16, #tpu.memory_space<vmem>>, %arg8: memref<512x256xbf16, #tpu.memory_space<vmem>>, %arg9: memref<1x256xbf16, #tpu.memory_space<vmem>>, %arg10: memref<256x128xbf16, #tpu.memory_space<vmem>>, %arg11: memref<1x128xf32, #tpu.memory_space<vmem>>, %arg12: memref<136x128xf32, #tpu.memory_space<vmem>>) attributes {dimension_semantics = [#tpu.dimension_semantics<parallel>], iteration_bounds = array<i64: 1>, scalar_prefetch = 0 : i64, scratch_operands = 0 : i64, tpu.core_type = #tpu.core_type<tc>, window_params = [{transform_indices = @transform_0, window_bounds = array<i64: 136, 32>}, {pipeline_mode = #tpu.pipeline_mode<synchronous>, transform_indices = @transform_1, window_bounds = array<i64: 32, 256>}, {pipeline_mode = #tpu.pipeline_mode<synchronous>, transform_indices = @transform_2, window_bounds = array<i64: 1, 256>}, {pipeline_mode = #tpu.pipeline_mode<synchronous>, transform_indices = @transform_3, window_bounds = array<i64: 256, 256>}, {pipeline_mode = #tpu.pipeline_mode<synchronous>, transform_indices = @transform_4, window_bounds = array<i64: 1, 256>}, {pipeline_mode = #tpu.pipeline_mode<synchronous>, transform_indices = @transform_5, window_bounds = array<i64: 256, 512>}, {pipeline_mode = #tpu.pipeline_mode<synchronous>, transform_indices = @transform_6, window_bounds = array<i64: 1, 512>}, {pipeline_mode = #tpu.pipeline_mode<synchronous>, transform_indices = @transform_7, window_bounds = array<i64: 512, 256>}, {pipeline_mode = #tpu.pipeline_mode<synchronous>, transform_indices = @transform_8, window_bounds = array<i64: 1, 256>}, {pipeline_mode = #tpu.pipeline_mode<synchronous>, transform_indices = @transform_9, window_bounds = array<i64: 256, 128>}, {pipeline_mode = #tpu.pipeline_mode<synchronous>, transform_indices = @transform_10, window_bounds = array<i64: 1, 128>}, {transform_indices = @transform_11, window_bounds = array<i64: 136, 128>}]} {
    %c0 = arith.constant 0 : index
    %c0_0 = arith.constant 0 : index
    %0 = vector.load %arg1[%c0, %c0_0] : memref<136x32xf32, #tpu.memory_space<vmem>>, vector<136x32xf32>
    %1 = arith.truncf %0 : vector<136x32xf32> to vector<136x32xbf16>
    %c0_1 = arith.constant 0 : index
    %c0_2 = arith.constant 0 : index
    %2 = vector.load %arg2[%c0_1, %c0_2] : memref<32x256xbf16, #tpu.memory_space<vmem>>, vector<32x256xbf16>
    %cst = arith.constant dense<0.000000e+00> : vector<136x256xf32>
    %3 = tpu.matmul %1, %2, %cst {dimension_numbers = #tpu.dot_dimension_numbers<[1], [0], [0], [1], [0, 0, 1, 1], [], []>} : vector<136x32xbf16>, vector<32x256xbf16>, vector<136x256xf32> -> vector<136x256xf32>
    %4 = arith.truncf %3 : vector<136x256xf32> to vector<136x256xbf16>
    %c0_3 = arith.constant 0 : index
    %c0_4 = arith.constant 0 : index
    %5 = vector.load %arg3[%c0_3, %c0_4] : memref<1x256xbf16, #tpu.memory_space<vmem>>, vector<1x256xbf16>
    %6 = vector.broadcast %5 : vector<1x256xbf16> to vector<136x256xbf16>
    %7 = arith.addf %4, %6 : vector<136x256xbf16>
    %cst_5 = arith.constant 0.000000e+00 : bf16
    %8 = vector.broadcast %cst_5 : bf16 to vector<136x256xbf16>
    %9 = arith.maximumf %7, %8 : vector<136x256xbf16>
    %c0_6 = arith.constant 0 : index
    %c0_7 = arith.constant 0 : index
    %10 = vector.load %arg4[%c0_6, %c0_7] : memref<256x256xbf16, #tpu.memory_space<vmem>>, vector<256x256xbf16>
    %cst_8 = arith.constant dense<0.000000e+00> : vector<136x256xf32>
    %11 = tpu.matmul %9, %10, %cst_8 {dimension_numbers = #tpu.dot_dimension_numbers<[1], [0], [0], [1], [0, 0, 1, 1], [], []>} : vector<136x256xbf16>, vector<256x256xbf16>, vector<136x256xf32> -> vector<136x256xf32>
    %12 = arith.truncf %11 : vector<136x256xf32> to vector<136x256xbf16>
    %c0_9 = arith.constant 0 : index
    %c0_10 = arith.constant 0 : index
    %13 = vector.load %arg5[%c0_9, %c0_10] : memref<1x256xbf16, #tpu.memory_space<vmem>>, vector<1x256xbf16>
    %14 = vector.broadcast %13 : vector<1x256xbf16> to vector<136x256xbf16>
    %15 = arith.addf %12, %14 : vector<136x256xbf16>
    %cst_11 = arith.constant 0.000000e+00 : bf16
    %16 = vector.broadcast %cst_11 : bf16 to vector<136x256xbf16>
    %17 = arith.maximumf %15, %16 : vector<136x256xbf16>
    %c0_12 = arith.constant 0 : index
    %c0_13 = arith.constant 0 : index
    %18 = vector.load %arg6[%c0_12, %c0_13] : memref<256x512xbf16, #tpu.memory_space<vmem>>, vector<256x512xbf16>
    %cst_14 = arith.constant dense<0.000000e+00> : vector<136x512xf32>
    %19 = tpu.matmul %17, %18, %cst_14 {dimension_numbers = #tpu.dot_dimension_numbers<[1], [0], [0], [1], [0, 0, 1, 1], [], []>} : vector<136x256xbf16>, vector<256x512xbf16>, vector<136x512xf32> -> vector<136x512xf32>
    %20 = arith.truncf %19 : vector<136x512xf32> to vector<136x512xbf16>
    %c0_15 = arith.constant 0 : index
    %c0_16 = arith.constant 0 : index
    %21 = vector.load %arg7[%c0_15, %c0_16] : memref<1x512xbf16, #tpu.memory_space<vmem>>, vector<1x512xbf16>
    %22 = vector.broadcast %21 : vector<1x512xbf16> to vector<136x512xbf16>
    %23 = arith.addf %20, %22 : vector<136x512xbf16>
    %cst_17 = arith.constant 0.000000e+00 : bf16
    %24 = vector.broadcast %cst_17 : bf16 to vector<136x512xbf16>
    %25 = arith.maximumf %23, %24 : vector<136x512xbf16>
    %c0_18 = arith.constant 0 : index
    %c0_19 = arith.constant 0 : index
    %26 = vector.load %arg8[%c0_18, %c0_19] : memref<512x256xbf16, #tpu.memory_space<vmem>>, vector<512x256xbf16>
    %cst_20 = arith.constant dense<0.000000e+00> : vector<136x256xf32>
    %27 = tpu.matmul %25, %26, %cst_20 {dimension_numbers = #tpu.dot_dimension_numbers<[1], [0], [0], [1], [0, 0, 1, 1], [], []>} : vector<136x512xbf16>, vector<512x256xbf16>, vector<136x256xf32> -> vector<136x256xf32>
    %28 = arith.truncf %27 : vector<136x256xf32> to vector<136x256xbf16>
    %c0_21 = arith.constant 0 : index
    %c0_22 = arith.constant 0 : index
    %29 = vector.load %arg9[%c0_21, %c0_22] : memref<1x256xbf16, #tpu.memory_space<vmem>>, vector<1x256xbf16>
    %30 = vector.broadcast %29 : vector<1x256xbf16> to vector<136x256xbf16>
    %31 = arith.addf %28, %30 : vector<136x256xbf16>
    %cst_23 = arith.constant 0.000000e+00 : bf16
    %32 = vector.broadcast %cst_23 : bf16 to vector<136x256xbf16>
    %33 = arith.maximumf %31, %32 : vector<136x256xbf16>
    %c0_24 = arith.constant 0 : index
    %c0_25 = arith.constant 0 : index
    %34 = vector.load %arg10[%c0_24, %c0_25] : memref<256x128xbf16, #tpu.memory_space<vmem>>, vector<256x128xbf16>
    %cst_26 = arith.constant dense<0.000000e+00> : vector<136x128xf32>
    %35 = tpu.matmul %33, %34, %cst_26 {dimension_numbers = #tpu.dot_dimension_numbers<[1], [0], [0], [1], [0, 0, 1, 1], [], []>} : vector<136x256xbf16>, vector<256x128xbf16>, vector<136x128xf32> -> vector<136x128xf32>
    %c0_27 = arith.constant 0 : index
    %c0_28 = arith.constant 0 : index
    %36 = vector.load %arg11[%c0_27, %c0_28] : memref<1x128xf32, #tpu.memory_space<vmem>>, vector<1x128xf32>
    %37 = vector.broadcast %36 : vector<1x128xf32> to vector<136x128xf32>
    %38 = arith.addf %35, %37 : vector<136x128xf32>
    %39 = vector.extract_strided_slice %38 {offsets = [0, 45], sizes = [136, 1], strides = [1, 1]} : vector<136x128xf32> to vector<136x1xf32>
    %cst_29 = arith.constant dense<0.000000e+00> : vector<136xf32>
    %40 = vector.multi_reduction <add>, %38, %cst_29 [1] : vector<136x128xf32> to vector<136xf32>
    %41 = vector.shape_cast %40 : vector<136xf32> to vector<136x1xf32>
    %42 = arith.subf %41, %39 : vector<136x1xf32>
    %cst_30 = arith.constant 0.0222222228 : f32
    %43 = vector.broadcast %cst_30 : f32 to vector<136x1xf32>
    %44 = arith.mulf %42, %43 : vector<136x1xf32>
    %45 = vector.broadcast %44 : vector<136x1xf32> to vector<136x128xf32>
    %46 = arith.subf %38, %45 : vector<136x128xf32>
    %47 = vector.broadcast %39 : vector<136x1xf32> to vector<136x128xf32>
    %48 = arith.addf %47, %46 : vector<136x128xf32>
    %c0_31 = arith.constant 0 : index
    %c0_32 = arith.constant 0 : index
    %49 = vector.load %arg12[%c0_31, %c0_32] : memref<136x128xf32, #tpu.memory_space<vmem>>, vector<136x128xf32>
    tpu.vector_store %arg12[%c0_31, %c0_32], %48 {strides = array<i32>} : memref<136x128xf32, #tpu.memory_space<vmem>>, vector<136x128xf32>,
    return
  }
  func.func @transform_0(%arg0: i32) -> (i32, i32) {
    %c0_i32 = arith.constant 0 : i32
    %c0_i32_0 = arith.constant 0 : i32
    return %arg0, %c0_i32 : i32, i32
  }
  func.func @transform_1(%arg0: i32) -> (i32, i32) {
    %c0_i32 = arith.constant 0 : i32
    %c0_i32_0 = arith.constant 0 : i32
    %c0_i32_1 = arith.constant 0 : i32
    return %c0_i32, %c0_i32_0 : i32, i32
  }
  func.func @transform_2(%arg0: i32) -> (i32, i32) {
    %c0_i32 = arith.constant 0 : i32
    %c0_i32_0 = arith.constant 0 : i32
    %c0_i32_1 = arith.constant 0 : i32
    return %c0_i32, %c0_i32_0 : i32, i32
  }
  func.func @transform_3(%arg0: i32) -> (i32, i32) {
    %c0_i32 = arith.constant 0 : i32
    %c0_i32_0 = arith.constant 0 : i32
    %c0_i32_1 = arith.constant 0 : i32
    return %c0_i32, %c0_i32_0 : i32, i32
  }
  func.func @transform_4(%arg0: i32) -> (i32, i32) {
    %c0_i32 = arith.constant 0 : i32
    %c0_i32_0 = arith.constant 0 : i32
    %c0_i32_1 = arith.constant 0 : i32
    return %c0_i32, %c0_i32_0 : i32, i32
  }
  func.func @transform_5(%arg0: i32) -> (i32, i32) {
    %c0_i32 = arith.constant 0 : i32
    %c0_i32_0 = arith.constant 0 : i32
    %c0_i32_1 = arith.constant 0 : i32
    return %c0_i32, %c0_i32_0 : i32, i32
  }
  func.func @transform_6(%arg0: i32) -> (i32, i32) {
    %c0_i32 = arith.constant 0 : i32
    %c0_i32_0 = arith.constant 0 : i32
    %c0_i32_1 = arith.constant 0 : i32
    return %c0_i32, %c0_i32_0 : i32, i32
  }
  func.func @transform_7(%arg0: i32) -> (i32, i32) {
    %c0_i32 = arith.constant 0 : i32
    %c0_i32_0 = arith.constant 0 : i32
    %c0_i32_1 = arith.constant 0 : i32
    return %c0_i32, %c0_i32_0 : i32, i32
  }
  func.func @transform_8(%arg0: i32) -> (i32, i32) {
    %c0_i32 = arith.constant 0 : i32
    %c0_i32_0 = arith.constant 0 : i32
    %c0_i32_1 = arith.constant 0 : i32
    return %c0_i32, %c0_i32_0 : i32, i32
  }
  func.func @transform_9(%arg0: i32) -> (i32, i32) {
    %c0_i32 = arith.constant 0 : i32
    %c0_i32_0 = arith.constant 0 : i32
    %c0_i32_1 = arith.constant 0 : i32
    return %c0_i32, %c0_i32_0 : i32, i32
  }
  func.func @transform_10(%arg0: i32) -> (i32, i32) {
    %c0_i32 = arith.constant 0 : i32
    %c0_i32_0 = arith.constant 0 : i32
    %c0_i32_1 = arith.constant 0 : i32
    return %c0_i32, %c0_i32_0 : i32, i32
  }
  func.func @transform_11(%arg0: i32) -> (i32, i32) {
    %c0_i32 = arith.constant 0 : i32
    %c0_i32_0 = arith.constant 0 : i32
    return %arg0, %c0_i32 : i32, i32
  }
}

</mosaic_0001>

<bundles_post_ra>
// kernel: tpu_custom_call.1
= control target key start
LH: loop header
LB: loop body
LE: loop exit
PB: predicated region body
PF: predicated region fallthrough
CT: control target
= control target key end

     0   :  { %16 = vsyncpa [#allocation3], 0  ;;  %s4172_s0 = inlined_call_operand.vmem [shape: f32[136,32], index: 0, kind: input, shape index: {}]   ;;  %s4173_s1 = inlined_call_operand.vmem [shape: bf16[32,256], index: 1, kind: input, shape index: {}]   ;;  %s4174_s2 = inlined_call_operand.vmem [shape: bf16[1,256], index: 2, kind: input, shape index: {}]   ;;  %s4175_s3 = inlined_call_operand.hbm [shape: bf16[256,256], index: 3, kind: input, shape index: {}]   ;;  %s4176_s4 = inlined_call_operand.vmem [shape: bf16[1,256], index: 4, kind: input, shape index: {}]   ;;  %s4177_s5 = inlined_call_operand.hbm [shape: bf16[256,512], index: 5, kind: input, shape index: {}]   ;;  %s4178_s6 = inlined_call_operand.vmem [shape: bf16[1,512], index: 6, kind: input, shape index: {}]   ;;  %s4179_s7 = inlined_call_operand.hbm [shape: bf16[512,256], index: 7, kind: input, shape index: {}]   ;;  %s4180_s8 = inlined_call_operand.vmem [shape: bf16[1,256], index: 8, kind: input, shape index: {}]   ;;  %s4181_s9 = inlined_call_operand.vmem [shape: bf16[256,128], index: 9, kind: input, shape index: {}]   ;;  %s4182_s10 = inlined_call_operand.vmem [shape: f32[1,128], index: 10, kind: input, shape index: {}]   ;;  %s4183_s11 = inlined_call_operand.hbm [shape: f32[136,128], index: 11, kind: output, shape index: {}]  }
   0x1   :  { %17 = vsyncpa [#allocation6], 0 }
   0x2   :  { %18 = vsyncpa [#allocation4], 0  ;;  %s3502_s17 = smov [#allocation5]   ;;  %s3408_s21 = scalar_lea.hbm %s4177_s5, 8192 }
   0x3   :  { %s44_s18 = sshll.u32 %s3502_s17, 4  ;;  %p3409_p0 = scmp.ne.s32.totalorder %s4177_s5, %s3408_s21  ;;  %s45_s18 = int_to_ptr.vmem [resolvable:$true] %s44_s18 }
   0x4   :  { %p3412_p1 = scmp.lt.u32.totalorder %s3408_s21, %s4177_s5 }
   0x6   :  { %p3414_p2 = pnand %p3412_p1, %p3409_p0 }
   0x8   :  { %3417 = shalt.err (!%p3414_p2)
}
   0x9   :  { %s3418_s26 = scalar_lea.vmem %s45_s18, 8192  ;;  %p3423_p4 = scmp.lt.s32.totalorder %s45_s18, %s45_s18 }
   0xa   :  { %p3419_p3 = scmp.ne.s32.totalorder %s45_s18, %s3418_s26  ;;  %p3424_p5 = scmp.lt.s32.totalorder %s3418_s26, %s3418_s26 }
   0xc   :  { %p3425_p6 = por %p3424_p5, %p3423_p4 }
   0xe   :  { %p3426_p7 = pnand %p3425_p6, %p3419_p3 }
  0x10   :  { %3429 = shalt.err (!%p3426_p7)
}
  0x11   :  { %s3503_s27 = smov 256   ;;  %s3504_s28 = smov 16  }
  0x12   :  { %50 = dma.hbm_to_vmem [thread:$0]  %s4177_s5, 8192, %s45_s18, [#allocation6], %s3503_s27, %s3503_s27, %s3504_s28  }
  0x13   :  { %s3505_s12 = smov [#allocation2]   ;;  %s3430_s16 = scalar_lea.hbm %s4175_s3, 4096 }
  0x14   :  { %s30_s13 = sshll.u32 %s3505_s12, 4  ;;  %p3431_p8 = scmp.ne.s32.totalorder %s4175_s3, %s3430_s16  ;;  %s31_s13 = int_to_ptr.vmem [resolvable:$true] %s30_s13 }
  0x15   :  { %p3434_p9 = scmp.lt.u32.totalorder %s3430_s16, %s4175_s3 }
  0x17   :  { %p3436_p10 = pnand %p3434_p9, %p3431_p8 }
  0x19   :  { %3439 = shalt.err (!%p3436_p10)
}
  0x1a   :  { %s3440_s22 = scalar_lea.vmem %s31_s13, 4096  ;;  %p3445_p12 = scmp.lt.s32.totalorder %s31_s13, %s31_s13 }
  0x1b   :  { %p3441_p11 = scmp.ne.s32.totalorder %s31_s13, %s3440_s22  ;;  %p3446_p13 = scmp.lt.s32.totalorder %s3440_s22, %s3440_s22 }
  0x1d   :  { %p3447_p0 = por %p3446_p13, %p3445_p12 }
  0x1f   :  { %p3448_p1 = pnand %p3447_p0, %p3441_p11 }
  0x21   :  { %3451 = shalt.err (!%p3448_p1)
}
  0x22   :  { %s3506_s5 = smov 128   ;;  %s3507_s18 = smov 8  }
  0x23   :  { %36 = dma.hbm_to_vmem [thread:$0]  %s4175_s3, 4096, %s31_s13, [#allocation3], %s3506_s5, %s3506_s5, %s3507_s18  }
  0x24   :  { %s3508_s25 = smov [#allocation7]   ;;  %s3452_s29 = scalar_lea.hbm %s4179_s7, 8192 }
  0x25   :  { %s58_s26 = sshll.u32 %s3508_s25, 4  ;;  %p3453_p2 = scmp.ne.s32.totalorder %s4179_s7, %s3452_s29  ;;  %s59_s26 = int_to_ptr.vmem [resolvable:$true] %s58_s26 }
  0x26   :  { %p3456_p3 = scmp.lt.u32.totalorder %s3452_s29, %s4179_s7 }
  0x28   :  { %p3458_p4 = pnand %p3456_p3, %p3453_p2 }
  0x2a   :  { %3461 = shalt.err (!%p3458_p4)
}
  0x2b   :  { %s3462_s16 = scalar_lea.vmem %s59_s26, 8192  ;;  %p3467_p6 = scmp.lt.s32.totalorder %s59_s26, %s59_s26 }
  0x2c   :  { %p3463_p5 = scmp.ne.s32.totalorder %s59_s26, %s3462_s16  ;;  %p3468_p7 = scmp.lt.s32.totalorder %s3462_s16, %s3462_s16 }
  0x2e   :  { %p3469_p8 = por %p3468_p7, %p3467_p6 }
  0x30   :  { %p3470_p9 = pnand %p3469_p8, %p3463_p5 }
  0x32   :  { %3473 = shalt.err (!%p3470_p9)
}
  0x33   :  { %64 = dma.hbm_to_vmem [thread:$0]  %s4179_s7, 8192, %s59_s26, [#allocation6], %s3506_s5, %s3506_s5, %s3507_s18  }
  0x34   :  { %3496 = dma.done.wait [#allocation3], 4096  }
  0x35   :  { %3497 = vsyncadd [#allocation3], 4294963200 }
  0x36   :  { %3498 = dma.done.wait [#allocation6], 16384  }
  0x37   :  { %3499 = vsyncadd [#allocation6], 4294950912  ;;  %v3509_v0 = vmov 0   ;;  %v3146_v1 = vld [vmem:[%s4173_s1 + $0x4] ss:$8 sps:$4 sm:$0xff]   ;;  %vm131_vm0 = vcmask 261120  }
  0x38   :  { %191 = vmatprep.mubr.bf16.mxu0 %v3509_v0  ;;  %271 = vmatprep.mubr.bf16.mxu1 %v3509_v0  ;;  %v3148_v2 = vld [vmem:[%s4173_s1] ss:$8 sps:$4 sm:$0xff]   ;;  %v3149_v3 = vld [vmem:[%s4173_s1 + $0x14] ss:$8 sps:$4 sm:$0xff]   ;;  %v3151_v4 = vld [vmem:[%s4173_s1 + $0x10] ss:$8 sps:$4 sm:$0xff]  }
  0x39   :  { %159 = vmatprep.subr.bf16.mxu0 %v3146_v1  ;;  %3093 = vmatprep.subr.bf16.mxu1 %v3146_v1  ;;  %v81_v5 = vld [vmem:[%s4172_s0] sm:$0xff]  ;;  %v82_v6 = vld [vmem:[%s4172_s0 + $0x8] sm:$0xff]  ;;  %v83_v12 = vld [vmem:[%s4172_s0 + $0x10] sm:$0xff] }
  0x3a   :  { %160 = vmatpush1.bf16.msra.mxu0 %v3148_v2  ;;  %3095 = vmatpush1.bf16.msra.mxu1 %v3148_v2  ;;  %v98_v7 = vpack.c.bf16 %v82_v6, %v81_v5  ;;  %v97_v8 = vld [vmem:[%s4172_s0 + $0x80] sm:$0xff]  ;;  %v3152_v10 = vld [vmem:[#allocation2] ss:$8 sps:$4 sm:$0xff]   ;;  %v3154_v11 = vld [vmem:[#allocation2 + $0x4] ss:$8 sps:$4 sm:$0xff]  }
  0x3b   :  { %161 = vmatprep.subr.bf16.mxu0 %v3149_v3  ;;  %3094 = vmatprep.subr.bf16.mxu1 %v3149_v3  ;;  %v106_v9 = vpack.c.bf16 %v97_v8, %v97_v8  ;;  %v3157_v13 = vld [vmem:[#allocation2 + $0x14] ss:$8 sps:$4 sm:$0xff]   ;;  %v3155_v15 = vld [vmem:[#allocation2 + $0x10] ss:$8 sps:$4 sm:$0xff]   ;;  %v3160_v17 = vld [vmem:[#allocation2 + $0x24] ss:$8 sps:$4 sm:$0xff]  }
  0x3c   :  { %v84_v14 = vld [vmem:[%s4172_s0 + $0x18] sm:$0xff]  ;;  %v3158_v18 = vld [vmem:[#allocation2 + $0x20] ss:$8 sps:$4 sm:$0xff]   ;;  %v85_v19 = vld [vmem:[%s4172_s0 + $0x20] sm:$0xff] }
  0x3d   :  { %v99_v16 = vpack.c.bf16 %v84_v14, %v83_v12  ;;  %v3163_v20 = vld [vmem:[#allocation2 + $0x34] ss:$8 sps:$4 sm:$0xff]   ;;  %v86_v21 = vld [vmem:[%s4172_s0 + $0x28] sm:$0xff]  ;;  %v3161_v22 = vld [vmem:[#allocation2 + $0x30] ss:$8 sps:$4 sm:$0xff]  }
  0x3e   :  { %162 = vmatpush1.bf16.msra.mxu0 %v3151_v4  ;;  %3096 = vmatpush1.bf16.msra.mxu1 %v3151_v4  ;;  %v100_v23 = vpack.c.bf16 %v86_v21, %v85_v19  ;;  %v3166_v24 = vld [vmem:[#allocation2 + $0x44] ss:$8 sps:$4 sm:$0xff]   ;;  %v3164_v26 = vld [vmem:[#allocation2 + $0x40] ss:$8 sps:$4 sm:$0xff]   ;;  %v88_v27 = vld [vmem:[%s4172_s0 + $0x38] sm:$0xff] }
  0x3f   :  { %564 = vmatprep.subr.bf16.mxu1 %v3154_v11  ;;  %v87_v25 = vld [vmem:[%s4172_s0 + $0x30] sm:$0xff]  ;;  %v3169_v28 = vld [vmem:[#allocation2 + $0x54] ss:$8 sps:$4 sm:$0xff]   ;;  %v3167_v29 = vld [vmem:[#allocation2 + $0x50] ss:$8 sps:$4 sm:$0xff]  }
  0x40   :  { %v3172_v30 = vld [vmem:[#allocation2 + $0x64] ss:$8 sps:$4 sm:$0xff]   ;;  %v101_v31 = vpack.c.bf16 %v88_v27, %v87_v25  ;;  %v3170_v32 = vld [vmem:[#allocation2 + $0x60] ss:$8 sps:$4 sm:$0xff]   ;;  %v3175_v33 = vld [vmem:[#allocation2 + $0x74] ss:$8 sps:$4 sm:$0xff]  }
  0x41   :  { %2833 = vmatmul.mubr.msk.bf16.vlgmr.msra.gmra.mrb[0].mxu0 %vm131_vm0, %v98_v7  ;;  %2841 = vmatmul.mubr.msk.bf16.vlgmr.msra.gmra.mrb[0].mxu1 %vm131_vm0, %v106_v9  ;;  %v89_v34 = vld [vmem:[%s4172_s0 + $0x40] sm:$0xff]  ;;  %v90_v35 = vld [vmem:[%s4172_s0 + $0x48] sm:$0xff]  ;;  %v91_v41 = vld [vmem:[%s4172_s0 + $0x50] sm:$0xff] }
  0x42   :  { %201 = vmatprep.mubr.bf16.mxu0 %v3509_v0  ;;  %565 = vmatpush1.bf16.msra.mxu1 %v3152_v10  ;;  %v3173_v36 = vld [vmem:[#allocation2 + $0x70] ss:$8 sps:$4 sm:$0xff]   ;;  %v3178_v37 = vld [vmem:[#allocation2 + $0x84] ss:$8 sps:$4 sm:$0xff]   ;;  %v102_v38 = vpack.c.bf16 %v90_v35, %v89_v34  ;;  %v3176_v39 = vld [vmem:[#allocation2 + $0x80] ss:$8 sps:$4 sm:$0xff]  }
  0x43   :  { %566 = vmatprep.subr.bf16.mxu1 %v3157_v13  ;;  %v3181_v40 = vld [vmem:[#allocation2 + $0x94] ss:$8 sps:$4 sm:$0xff]   ;;  %v3179_v43 = vld [vmem:[#allocation2 + $0x90] ss:$8 sps:$4 sm:$0xff]   ;;  %v3184_v44 = vld [vmem:[#allocation2 + $0xa4] ss:$8 sps:$4 sm:$0xff]  }
  0x44   :  { %v92_v42 = vld [vmem:[%s4172_s0 + $0x58] sm:$0xff]  ;;  %v3182_v46 = vld [vmem:[#allocation2 + $0xa0] ss:$8 sps:$4 sm:$0xff]   ;;  %v93_v48 = vld [vmem:[%s4172_s0 + $0x60] sm:$0xff] }
  0x45   :  { %v103_v45 = vpack.c.bf16 %v92_v42, %v91_v41  ;;  %v3187_v47 = vld [vmem:[#allocation2 + $0xb4] ss:$8 sps:$4 sm:$0xff]   ;;  %v94_v49 = vld [vmem:[%s4172_s0 + $0x68] sm:$0xff]  ;;  %v3185_v50 = vld [vmem:[#allocation2 + $0xb0] ss:$8 sps:$4 sm:$0xff]  }
  0x46   :  { %567 = vmatpush1.bf16.msra.mxu1 %v3155_v15  ;;  %v3190_v51 = vld [vmem:[#allocation2 + $0xc4] ss:$8 sps:$4 sm:$0xff]   ;;  %v104_v52 = vpack.c.bf16 %v94_v49, %v93_v48  ;;  %v3188_v53 = vld [vmem:[#allocation2 + $0xc0] ss:$8 sps:$4 sm:$0xff]   ;;  %v3193_v54 = vld [vmem:[#allocation2 + $0xd4] ss:$8 sps:$4 sm:$0xff]  }
  0x47   :  { %568 = vmatprep.subr.bf16.mxu1 %v3160_v17  ;;  %v95_v55 = vld [vmem:[%s4172_s0 + $0x70] sm:$0xff]  ;;  %v96_v56 = vld [vmem:[%s4172_s0 + $0x78] sm:$0xff] }
  0x48   :  { %v3191_v57 = vld [vmem:[#allocation2 + $0xd0] ss:$8 sps:$4 sm:$0xff]   ;;  %v105_v58 = vpack.c.bf16 %v96_v56, %v95_v55  ;;  %v3196_v59 = vld [vmem:[#allocation2 + $0xe4] ss:$8 sps:$4 sm:$0xff]   ;;  %v3194_v60 = vld [vmem:[#allocation2 + $0xe0] ss:$8 sps:$4 sm:$0xff]  }
  0x49   :  { %2834 = vmatmul.mubr.msk.bf16.gmra.mrb[4].mxu0 %vm131_vm0, %v99_v16  ;;  %v3199_v61 = vld [vmem:[#allocation2 + $0xf4] ss:$8 sps:$4 sm:$0xff]   ;;  %v3197_v62 = vld [vmem:[#allocation2 + $0xf0] ss:$8 sps:$4 sm:$0xff]  }
  0x4a   :  { %211 = vmatprep.mubr.bf16.mxu0 %v3509_v0  ;;  %569 = vmatpush1.bf16.msra.mxu1 %v3158_v18  ;;  %v3200_v63 = vld [vmem:[#allocation5] ss:$16 sps:$4 sm:$0xff]   ;;  %v3202_v1 = vld [vmem:[#allocation5 + $0x4] ss:$16 sps:$4 sm:$0xff]   ;;  %v3205_v2 = vld [vmem:[#allocation5 + $0xc] ss:$16 sps:$4 sm:$0xff]  }
  0x4b   :  { %570 = vmatprep.subr.bf16.mxu1 %v3163_v20  ;;  %v3208_v3 = vld [vmem:[#allocation5 + $0x24] ss:$16 sps:$4 sm:$0xff]   ;;  %1161 = vmatprep.subr.bf16.mxu0 %v3202_v1  ;;  %v3206_v4 = vld [vmem:[#allocation5 + $0x20] ss:$16 sps:$4 sm:$0xff]   ;;  %v3510_v20 = vmov 1966171168  }
  0x4c   :  { %1162 = vmatpush1.bf16.msra.mxu0 %v3200_v63  ;;  %v3214_v5 = vld [vmem:[#allocation5 + $0x44] ss:$16 sps:$4 sm:$0xff]   ;;  %v3212_v6 = vld [vmem:[#allocation5 + $0x40] ss:$16 sps:$4 sm:$0xff]   ;;  %v309_v21 = vunpack.c.l.s4 %v3510_v20  ;;  %v3211_v63 = vld [vmem:[#allocation5 + $0x2c] ss:$16 sps:$4 sm:$0xff]  }
  0x4d   :  { %1163 = vmatprep.subr.bf16.mxu0 %v3208_v3  ;;  %v3220_v7 = vld [vmem:[#allocation5 + $0x64] ss:$16 sps:$4 sm:$0xff]   ;;  %v3218_v8 = vld [vmem:[#allocation5 + $0x60] ss:$16 sps:$4 sm:$0xff]  }
  0x4e   :  { %571 = vmatpush1.bf16.msra.mxu1 %v3161_v22  ;;  %v3226_v9 = vld [vmem:[#allocation5 + $0x84] ss:$16 sps:$4 sm:$0xff]   ;;  %v3224_v10 = vld [vmem:[#allocation5 + $0x80] ss:$16 sps:$4 sm:$0xff]   ;;  %v311_v22 = vlaneseq  ;;  %v310_v25 = vunpack.c.0.s8 %v309_v21  ;;  %v3229_v21 = vld [vmem:[#allocation5 + $0x8c] ss:$16 sps:$4 sm:$0xff]  }
  0x4f   :  { %572 = vmatprep.subr.bf16.mxu1 %v3166_v24  ;;  %v3232_v11 = vld [vmem:[#allocation5 + $0xa4] ss:$16 sps:$4 sm:$0xff]   ;;  %v3230_v12 = vld [vmem:[#allocation5 + $0xa0] ss:$16 sps:$4 sm:$0xff]  }
  0x50   :  { %1164 = vmatpush1.bf16.msra.mxu0 %v3206_v4  ;;  %v3238_v13 = vld [vmem:[#allocation5 + $0xc4] ss:$16 sps:$4 sm:$0xff]   ;;  %v3236_v14 = vld [vmem:[#allocation5 + $0xc0] ss:$16 sps:$4 sm:$0xff]  }
  0x51   :  { %2835 = vmatmul.mubr.msk.bf16.gmra.mrb[8].mxu0 %vm131_vm0, %v100_v23  ;;  %1165 = vmatprep.subr.bf16.mxu0 %v3214_v5  ;;  %v3244_v15 = vld [vmem:[#allocation5 + $0xe4] ss:$16 sps:$4 sm:$0xff]   ;;  %v3242_v16 = vld [vmem:[#allocation5 + $0xe0] ss:$16 sps:$4 sm:$0xff]   ;;  %v3209_v5 = vld [vmem:[#allocation5 + $0x28] ss:$16 sps:$4 sm:$0xff]  }
  0x52   :  { %221 = vmatprep.mubr.bf16.mxu0 %v3509_v0  ;;  %573 = vmatpush1.bf16.msra.mxu1 %v3164_v26  ;;  %v3250_v17 = vld [vmem:[#allocation5 + $0x104] ss:$16 sps:$4 sm:$0xff]   ;;  %v3248_v18 = vld [vmem:[#allocation5 + $0x100] ss:$16 sps:$4 sm:$0xff]   ;;  %v312_v26 = vshrl.u32 %v311_v22, 7 }
  0x53   :  { %574 = vmatprep.subr.bf16.mxu1 %v3169_v28  ;;  %v3256_v19 = vld [vmem:[#allocation5 + $0x124] ss:$16 sps:$4 sm:$0xff]   ;;  %v3254_v23 = vld [vmem:[#allocation5 + $0x120] ss:$16 sps:$4 sm:$0xff]  }
  0x54   :  { %1166 = vmatpush1.bf16.msra.mxu0 %v3212_v6  ;;  %v3262_v24 = vld [vmem:[#allocation5 + $0x144] ss:$16 sps:$4 sm:$0xff]   ;;  %v3260_v27 = vld [vmem:[#allocation5 + $0x140] ss:$16 sps:$4 sm:$0xff]  }
  0x55   :  { %1167 = vmatprep.subr.bf16.mxu0 %v3220_v7  ;;  %v2842_v28 = vld.sshfl [vmem:[%s4174_s2] sm:$0x11 pattern:$0x75316420]  ;;  %v3278_v41 = vld [vmem:[#allocation5 + $0x1a0] ss:$16 sps:$4 sm:$0xff]  }
  0x56   :  { %575 = vmatpush1.bf16.msra.mxu1 %v3167_v29  ;;  %v3268_v29 = vld [vmem:[#allocation5 + $0x164] ss:$16 sps:$4 sm:$0xff]   ;;  %v3217_v7 = vld [vmem:[#allocation5 + $0x4c] ss:$16 sps:$4 sm:$0xff]  }
  0x57   :  { %576 = vmatprep.subr.bf16.mxu1 %v3172_v30  ;;  %v3699_v30 = vsub.s32 %v310_v25, %v312_v26  ;;  %v3227_v25 = vld [vmem:[#allocation5 + $0x88] ss:$16 sps:$4 sm:$0xff]  }
  0x58   :  { %1168 = vmatpush1.bf16.msra.mxu0 %v3218_v8 }
  0x59   :  { %2836 = vmatmul.mubr.msk.bf16.gmra.mrb[12].mxu0 %vm131_vm0, %v101_v31  ;;  %1169 = vmatprep.subr.bf16.mxu0 %v3226_v9  ;;  %v307_v31 = vcombine.high %v2842_v28, %v2842_v28  ;;  %v314_v34 = vrot.slane %v2842_v28, %v3699_v30  ;;  %v3235_v28 = vld [vmem:[#allocation5 + $0xac] ss:$16 sps:$4 sm:$0xff]  }
  0x5a   :  { %231 = vmatprep.mubr.bf16.mxu0 %v3509_v0  ;;  %577 = vmatpush1.bf16.msra.mxu1 %v3170_v32  ;;  %v3266_v32 = vld [vmem:[#allocation5 + $0x160] ss:$16 sps:$4 sm:$0xff]  }
  0x5b   :  { %578 = vmatprep.subr.bf16.mxu1 %v3175_v33  ;;  %v3274_v33 = vld [vmem:[#allocation5 + $0x184] ss:$16 sps:$4 sm:$0xff]   ;;  %v321_v35 = vrot.slane %v307_v31, %v3699_v30 }
  0x5c   :  { %1170 = vmatpush1.bf16.msra.mxu0 %v3224_v10 }
  0x5d   :  { %1171 = vmatprep.subr.bf16.mxu0 %v3232_v11  ;;  %v3215_v11 = vld [vmem:[#allocation5 + $0x48] ss:$16 sps:$4 sm:$0xff]  }
  0x5e   :  { %579 = vmatpush1.bf16.msra.mxu1 %v3173_v36  ;;  %v3272_v36 = vld [vmem:[#allocation5 + $0x180] ss:$16 sps:$4 sm:$0xff]  }
  0x5f   :  { %580 = vmatprep.subr.bf16.mxu1 %v3178_v37  ;;  %v3280_v37 = vld [vmem:[#allocation5 + $0x1a4] ss:$16 sps:$4 sm:$0xff]  }
  0x60   :  { %1172 = vmatpush1.bf16.msra.mxu0 %v3230_v12 }
  0x61   :  { %2837 = vmatmul.mubr.msk.bf16.gmra.mrb[16].mxu0 %vm131_vm0, %v102_v38  ;;  %1173 = vmatprep.subr.bf16.mxu0 %v3238_v13  ;;  %v323_v38 = vpack.i.b16 %v314_v34, %v314_v34  ;;  %v3233_v34 = vld [vmem:[#allocation5 + $0xa8] ss:$16 sps:$4 sm:$0xff]  }
  0x62   :  { %241 = vmatprep.mubr.bf16.mxu0 %v3509_v0  ;;  %581 = vmatpush1.bf16.msra.mxu1 %v3176_v39  ;;  %v3703_v39 = vsub.s32 0, %v312_v26 }
  0x63   :  { %582 = vmatprep.subr.bf16.mxu1 %v3181_v40  ;;  %v330_v40 = vpack.i.b16 %v321_v35, %v321_v35 }
  0x64   :  { %1174 = vmatpush1.bf16.msra.mxu0 %v3236_v14  ;;  %v3223_v14 = vld [vmem:[#allocation5 + $0x6c] ss:$16 sps:$4 sm:$0xff]  }
  0x65   :  { %1175 = vmatprep.subr.bf16.mxu0 %v3244_v15 }
  0x66   :  { %583 = vmatpush1.bf16.msra.mxu1 %v3179_v43 }
  0x67   :  { %584 = vmatprep.subr.bf16.mxu1 %v3184_v44  ;;  %v3706_v44 = vrot.slane %v323_v38, %v3703_v39 }
  0x68   :  { %1176 = vmatpush1.bf16.msra.mxu0 %v3242_v16 }
  0x69   :  { %2838 = vmatmul.mubr.msk.bf16.gmra.mrb[20].mxu0 %vm131_vm0, %v103_v45  ;;  %1177 = vmatprep.subr.bf16.mxu0 %v3250_v17 }
  0x6a   :  { %251 = vmatprep.mubr.bf16.mxu0 %v3509_v0  ;;  %585 = vmatpush1.bf16.msra.mxu1 %v3182_v46 }
  0x6b   :  { %586 = vmatprep.subr.bf16.mxu1 %v3187_v47  ;;  %v3709_v47 = vrot.slane %v330_v40, %v3703_v39 }
  0x6c   :  { %1178 = vmatpush1.bf16.msra.mxu0 %v3248_v18 }
  0x6d   :  { %1179 = vmatprep.subr.bf16.mxu0 %v3256_v19  ;;  %v3221_v19 = vld [vmem:[#allocation5 + $0x68] ss:$16 sps:$4 sm:$0xff]  }
  0x6e   :  { %587 = vmatpush1.bf16.msra.mxu1 %v3185_v50 }
  0x6f   :  { %588 = vmatprep.subr.bf16.mxu1 %v3190_v51 }
  0x70   :  { %1180 = vmatpush1.bf16.msra.mxu0 %v3254_v23 }
  0x71   :  { %2839 = vmatmul.mubr.msk.bf16.gmra.mrb[24].mxu0 %vm131_vm0, %v104_v52  ;;  %1181 = vmatprep.subr.bf16.mxu0 %v3262_v24 }
  0x72   :  { %261 = vmatprep.mubr.bf16.mxu0 %v3509_v0  ;;  %589 = vmatpush1.bf16.msra.mxu1 %v3188_v53 }
  0x73   :  { %590 = vmatprep.subr.bf16.mxu1 %v3193_v54 }
  0x74   :  { %1182 = vmatpush1.bf16.msra.mxu0 %v3260_v27 }
  0x75   :  { %1183 = vmatprep.subr.bf16.mxu0 %v3268_v29 }
  0x76   :  { %591 = vmatpush1.bf16.msra.mxu1 %v3191_v57 }
  0x77   :  { %592 = vmatprep.subr.bf16.mxu1 %v3196_v59 }
  0x78   :  { %1184 = vmatpush1.bf16.msra.mxu0 %v3266_v32 }
  0x79   :  { %2840 = vmatmul.mubr.msk.bf16.gmra.mrb[28].mxu0 %vm131_vm0, %v105_v58  ;;  %1185 = vmatprep.subr.bf16.mxu0 %v3274_v33 }
  0x7a   :  { %593 = vmatpush1.bf16.msra.mxu1 %v3194_v60  ;;  %v3203_v60 = vld [vmem:[#allocation5 + $0x8] ss:$16 sps:$4 sm:$0xff]  }
  0x7b   :  { %594 = vmatprep.subr.bf16.mxu1 %v3199_v61 }
  0x7c   :  { %1186 = vmatpush1.bf16.msra.mxu0 %v3272_v36  ;;  %v3241_v36 = vld [vmem:[#allocation5 + $0xcc] ss:$16 sps:$4 sm:$0xff]  }
  0x7d   :  { %1187 = vmatprep.subr.bf16.mxu0 %v3280_v37 }
  0x7e   :  { %595 = vmatpush1.bf16.msra.mxu1 %v3197_v62 }
  0x7f   :  { %1282 = vmatprep.subr.bf16.mxu1 %v3205_v2 }
  0x80   :  { %1188 = vmatpush1.bf16.msra.mxu0 %v3278_v41  ;;  %v3239_v41 = vld [vmem:[#allocation5 + $0xc8] ss:$16 sps:$4 sm:$0xff]  }
 0x114   :  { %v193_v42 = vpop.f32.mrb[0].mxu0  ;;  %v273_v45 = vpop.f32.mrb[0].mxu1 }
 0x115   :  { %v195_v43 = vpop.f32.mrb[1].mxu0  ;;  %v296_v48 = vpack.c.bf16 %v273_v45, %v273_v45  ;;  %v3711_v49 = vpop.f32.mrb[1].mxu1  ;;  %v3247_v45 = vld [vmem:[#allocation5 + $0xec] ss:$16 sps:$4 sm:$0xff]  }
 0x116   :  { %v197_v46 = vpop.f32.mrb[2].mxu0  ;;  %v277_v52 = vpop.f32.mrb[2].mxu1 }
 0x117   :  { %v280_v50 = vpack.c.bf16 %v197_v46, %v193_v42  ;;  %v199_v51 = vpop.f32.mrb[3].mxu0  ;;  %v3714_v54 = vadd.bf16 %v3706_v44, %v296_v48  ;;  %v278_v55 = vpop.f32.mrb[3].mxu1  ;;  %v3245_v52 = vld [vmem:[#allocation5 + $0xe8] ss:$16 sps:$4 sm:$0xff]  }
 0x118   :  { %v281_v53 = vpack.c.bf16 %v199_v51, %v195_v43  ;;  %v3253_v55 = vld [vmem:[#allocation5 + $0x10c] ss:$16 sps:$4 sm:$0xff]  }
 0x119   :  { %v336_v56 = vadd.bf16 %v3706_v44, %v280_v50 }
 0x11a   :  { %v337_v57 = vadd.bf16 %v3709_v47, %v281_v53 }
 0x11b   :  { %v354_v61 = vmax.bf16 %v3509_v0, %v336_v56 }
 0x11c   :  { %v203_v58 = vpop.f32.mrb[4].mxu0  ;;  %v355_v59 = vmax.bf16 %v3509_v0, %v337_v57 }
 0x11d   :  { %v205_v62 = vpop.f32.mrb[5].mxu0 }
 0x11e   :  { %v207_v1 = vpop.f32.mrb[6].mxu0  ;;  %596 = vmatprep.mubr.bf16.mxu1 %v355_v59  ;;  %v3251_v59 = vld [vmem:[#allocation5 + $0x108] ss:$16 sps:$4 sm:$0xff]  }
 0x11f   :  { %v282_v2 = vpack.c.bf16 %v207_v1, %v203_v58  ;;  %v209_v3 = vpop.f32.mrb[7].mxu0  ;;  %597 = vmatmul.mubr.bf16.vlgmr.msra.gmra.mrb[4].mxu1 %v354_v61 }
 0x120   :  { %v283_v4 = vpack.c.bf16 %v209_v3, %v205_v62  ;;  %1283 = vmatpush1.bf16.msra.mxu1 %v3203_v60  ;;  %v3259_v62 = vld [vmem:[#allocation5 + $0x12c] ss:$16 sps:$4 sm:$0xff]  }
 0x121   :  { %v338_v6 = vadd.bf16 %v3706_v44, %v282_v2  ;;  %1284 = vmatprep.subr.bf16.mxu1 %v3211_v63 }
 0x122   :  { %v339_v8 = vadd.bf16 %v3709_v47, %v283_v4  ;;  %v3257_v4 = vld [vmem:[#allocation5 + $0x128] ss:$16 sps:$4 sm:$0xff]  }
 0x123   :  { %v356_v13 = vmax.bf16 %v3509_v0, %v338_v6  ;;  %v3265_v6 = vld [vmem:[#allocation5 + $0x14c] ss:$16 sps:$4 sm:$0xff]  }
 0x124   :  { %v213_v9 = vpop.f32.mrb[8].mxu0  ;;  %v357_v10 = vmax.bf16 %v3509_v0, %v339_v8  ;;  %1285 = vmatpush1.bf16.msra.mxu1 %v3209_v5 }
 0x125   :  { %v215_v12 = vpop.f32.mrb[9].mxu0  ;;  %1286 = vmatprep.subr.bf16.mxu1 %v3217_v7 }
 0x126   :  { %v217_v15 = vpop.f32.mrb[10].mxu0  ;;  %606 = vmatprep.mubr.bf16.mxu1 %v357_v10  ;;  %v3263_v10 = vld [vmem:[#allocation5 + $0x148] ss:$16 sps:$4 sm:$0xff]  }
 0x127   :  { %v284_v16 = vpack.c.bf16 %v217_v15, %v213_v9  ;;  %v219_v17 = vpop.f32.mrb[11].mxu0  ;;  %607 = vmatmul.mubr.bf16.gmra.mrb[8].mxu1 %v356_v13  ;;  %v3271_v13 = vld [vmem:[#allocation5 + $0x16c] ss:$16 sps:$4 sm:$0xff]  }
 0x128   :  { %v285_v18 = vpack.c.bf16 %v219_v17, %v215_v12  ;;  %1287 = vmatpush1.bf16.msra.mxu1 %v3215_v11 }
 0x129   :  { %v340_v20 = vadd.bf16 %v3706_v44, %v284_v16  ;;  %1288 = vmatprep.subr.bf16.mxu1 %v3223_v14 }
 0x12a   :  { %v341_v22 = vadd.bf16 %v3709_v47, %v285_v18  ;;  %v3269_v18 = vld [vmem:[#allocation5 + $0x168] ss:$16 sps:$4 sm:$0xff]  }
 0x12b   :  { %v358_v27 = vmax.bf16 %v3509_v0, %v340_v20  ;;  %v3277_v20 = vld [vmem:[#allocation5 + $0x18c] ss:$16 sps:$4 sm:$0xff]  }
 0x12c   :  { %v223_v23 = vpop.f32.mrb[12].mxu0  ;;  %v359_v24 = vmax.bf16 %v3509_v0, %v341_v22  ;;  %1289 = vmatpush1.bf16.msra.mxu1 %v3221_v19 }
 0x12d   :  { %v225_v26 = vpop.f32.mrb[13].mxu0  ;;  %1290 = vmatprep.subr.bf16.mxu1 %v3229_v21 }
 0x12e   :  { %v227_v29 = vpop.f32.mrb[14].mxu0  ;;  %616 = vmatprep.mubr.bf16.mxu1 %v359_v24  ;;  %v297_v24 = vpack.c.bf16 %v3711_v49, %v3711_v49 }
 0x12f   :  { %v286_v31 = vpack.c.bf16 %v227_v29, %v223_v23  ;;  %v229_v32 = vpop.f32.mrb[15].mxu0  ;;  %617 = vmatmul.mubr.bf16.gmra.mrb[12].mxu1 %v358_v27 }
 0x130   :  { %v287_v33 = vpack.c.bf16 %v229_v32, %v225_v26  ;;  %1291 = vmatpush1.bf16.msra.mxu1 %v3227_v25  ;;  %v3275_v25 = vld [vmem:[#allocation5 + $0x188] ss:$16 sps:$4 sm:$0xff]  }
 0x131   :  { %v342_v35 = vadd.bf16 %v3706_v44, %v286_v31  ;;  %1292 = vmatprep.subr.bf16.mxu1 %v3235_v28  ;;  %v3283_v28 = vld [vmem:[#allocation5 + $0x1ac] ss:$16 sps:$4 sm:$0xff]  }
 0x132   :  { %v343_v37 = vadd.bf16 %v3709_v47, %v287_v33 }
 0x133   :  { %v360_v43 = vmax.bf16 %v3509_v0, %v342_v35  ;;  %v3281_v35 = vld [vmem:[#allocation5 + $0x1a8] ss:$16 sps:$4 sm:$0xff]  }
 0x134   :  { %v233_v38 = vpop.f32.mrb[16].mxu0  ;;  %v361_v40 = vmax.bf16 %v3509_v0, %v343_v37  ;;  %1293 = vmatpush1.bf16.msra.mxu1 %v3233_v34  ;;  %v353_v34 = vadd.bf16 %v3709_v47, %v297_v24  ;;  %v3307_v24 = vld [vmem:[#allocation7 + $0x34] ss:$8 sps:$4 sm:$0xff]  }
 0x135   :  { %v235_v42 = vpop.f32.mrb[17].mxu0  ;;  %1294 = vmatprep.subr.bf16.mxu1 %v3241_v36 }
 0x136   :  { %v237_v46 = vpop.f32.mrb[18].mxu0  ;;  %626 = vmatprep.mubr.bf16.mxu1 %v361_v40 }
 0x137   :  { %v288_v48 = vpack.c.bf16 %v237_v46, %v233_v38  ;;  %v239_v50 = vpop.f32.mrb[19].mxu0  ;;  %627 = vmatmul.mubr.bf16.gmra.mrb[16].mxu1 %v360_v43  ;;  %v371_v38 = vmax.bf16 %v3509_v0, %v353_v34  ;;  %v3289_v43 = vld [vmem:[#allocation5 + $0x1cc] ss:$16 sps:$4 sm:$0xff]  }
 0x138   :  { %v289_v51 = vpack.c.bf16 %v239_v50, %v235_v42  ;;  %1295 = vmatpush1.bf16.msra.mxu1 %v3239_v41  ;;  %v370_v41 = vmax.bf16 %v3509_v0, %v3714_v54  ;;  %v3286_v42 = vld [vmem:[#allocation5 + $0x1c4] ss:$16 sps:$4 sm:$0xff]   ;;  %v3295_v46 = vld [vmem:[#allocation5 + $0x1ec] ss:$16 sps:$4 sm:$0xff]   ;;  %v3293_v50 = vld [vmem:[#allocation5 + $0x1e8] ss:$16 sps:$4 sm:$0xff]  }
 0x139   :  { %v344_v53 = vadd.bf16 %v3706_v44, %v288_v48  ;;  %1296 = vmatprep.subr.bf16.mxu1 %v3247_v45  ;;  %v3287_v45 = vld [vmem:[#allocation5 + $0x1c8] ss:$16 sps:$4 sm:$0xff]   ;;  %1189 = vmatprep.subr.bf16.mxu0 %v3286_v42  ;;  %v3290_v48 = vld [vmem:[#allocation5 + $0x1e0] ss:$16 sps:$4 sm:$0xff]  }
 0x13a   :  { %v345_v56 = vadd.bf16 %v3709_v47, %v289_v51  ;;  %v3298_v51 = vld [vmem:[#allocation7 + $0x4] ss:$8 sps:$4 sm:$0xff]   ;;  %v2875_v54 = vld.sshfl [vmem:[%s4176_s4] sm:$0x11 pattern:$0x75316420] }
 0x13b   :  { %v362_v61 = vmax.bf16 %v3509_v0, %v344_v53  ;;  %v719_v53 = vrot.slane %v2875_v54, %v3699_v30 }
 0x13c   :  { %v243_v57 = vpop.f32.mrb[20].mxu0  ;;  %v363_v58 = vmax.bf16 %v3509_v0, %v345_v56  ;;  %1297 = vmatpush1.bf16.msra.mxu1 %v3245_v52  ;;  %v712_v52 = vcombine.high %v2875_v54, %v2875_v54 }
 0x13d   :  { %v245_v60 = vpop.f32.mrb[21].mxu0  ;;  %1298 = vmatprep.subr.bf16.mxu1 %v3253_v55  ;;  %v728_v56 = vpack.i.b16 %v719_v53, %v719_v53  ;;  %v3319_v53 = vld [vmem:[#allocation7 + $0x74] ss:$8 sps:$4 sm:$0xff]  }
 0x13e   :  { %v247_v63 = vpop.f32.mrb[22].mxu0  ;;  %636 = vmatprep.mubr.bf16.mxu1 %v363_v58  ;;  %v726_v55 = vrot.slane %v712_v52, %v3699_v30 }
 0x13f   :  { %v290_v1 = vpack.c.bf16 %v247_v63, %v243_v57  ;;  %v249_v2 = vpop.f32.mrb[23].mxu0  ;;  %637 = vmatmul.mubr.bf16.gmra.mrb[20].mxu1 %v362_v61 }
 0x140   :  { %v291_v3 = vpack.c.bf16 %v249_v2, %v245_v60  ;;  %1299 = vmatpush1.bf16.msra.mxu1 %v3251_v59  ;;  %v735_v57 = vpack.i.b16 %v726_v55, %v726_v55  ;;  %v3760_v60 = vrot.slane %v728_v56, %v3703_v39 }
 0x141   :  { %v346_v5 = vadd.bf16 %v3706_v44, %v290_v1  ;;  %1300 = vmatprep.subr.bf16.mxu1 %v3259_v62 }
 0x142   :  { %v347_v7 = vadd.bf16 %v3709_v47, %v291_v3  ;;  %v3763_v62 = vrot.slane %v735_v57, %v3703_v39 }
 0x143   :  { %v364_v12 = vmax.bf16 %v3509_v0, %v346_v5 }
 0x144   :  { %v253_v8 = vpop.f32.mrb[24].mxu0  ;;  %v365_v9 = vmax.bf16 %v3509_v0, %v347_v7  ;;  %1301 = vmatpush1.bf16.msra.mxu1 %v3257_v4  ;;  %v3296_v7 = vld [vmem:[#allocation7] ss:$8 sps:$4 sm:$0xff]  }
 0x145   :  { %v255_v11 = vpop.f32.mrb[25].mxu0  ;;  %1302 = vmatprep.subr.bf16.mxu1 %v3265_v6 }
 0x146   :  { %v257_v14 = vpop.f32.mrb[26].mxu0  ;;  %646 = vmatprep.mubr.bf16.mxu1 %v365_v9 }
 0x147   :  { %v292_v15 = vpack.c.bf16 %v257_v14, %v253_v8  ;;  %v259_v16 = vpop.f32.mrb[27].mxu0  ;;  %647 = vmatmul.mubr.bf16.gmra.mrb[24].mxu1 %v364_v12 }
 0x148   :  { %v293_v17 = vpack.c.bf16 %v259_v16, %v255_v11  ;;  %1303 = vmatpush1.bf16.msra.mxu1 %v3263_v10  ;;  %v3301_v10 = vld [vmem:[#allocation7 + $0x14] ss:$8 sps:$4 sm:$0xff]  }
 0x149   :  { %v348_v19 = vadd.bf16 %v3706_v44, %v292_v15  ;;  %1304 = vmatprep.subr.bf16.mxu1 %v3271_v13  ;;  %v3299_v15 = vld [vmem:[#allocation7 + $0x10] ss:$8 sps:$4 sm:$0xff]  }
 0x14a   :  { %v349_v21 = vadd.bf16 %v3709_v47, %v293_v17  ;;  %v3304_v17 = vld [vmem:[#allocation7 + $0x24] ss:$8 sps:$4 sm:$0xff]  }
 0x14b   :  { %v366_v27 = vmax.bf16 %v3509_v0, %v348_v19 }
 0x14c   :  { %v263_v22 = vpop.f32.mrb[28].mxu0  ;;  %v367_v23 = vmax.bf16 %v3509_v0, %v349_v21  ;;  %1305 = vmatpush1.bf16.msra.mxu1 %v3269_v18  ;;  %v3302_v21 = vld [vmem:[#allocation7 + $0x20] ss:$8 sps:$4 sm:$0xff]  }
 0x14d   :  { %v265_v26 = vpop.f32.mrb[29].mxu0  ;;  %1306 = vmatprep.subr.bf16.mxu1 %v3277_v20 }
 0x14e   :  { %v267_v29 = vpop.f32.mrb[30].mxu0  ;;  %656 = vmatprep.mubr.bf16.mxu1 %v367_v23 }
 0x14f   :  { %v294_v31 = vpack.c.bf16 %v267_v29, %v263_v22  ;;  %v269_v32 = vpop.f32.mrb[31].mxu0  ;;  %657 = vmatmul.mubr.bf16.gmra.mrb[28].mxu1 %v366_v27  ;;  %v3305_v29 = vld [vmem:[#allocation7 + $0x30] ss:$8 sps:$4 sm:$0xff]  }
 0x150   :  { %v295_v33 = vpack.c.bf16 %v269_v32, %v265_v26  ;;  %1307 = vmatpush1.bf16.msra.mxu1 %v3275_v25  ;;  %v3310_v32 = vld [vmem:[#allocation7 + $0x44] ss:$8 sps:$4 sm:$0xff]  }
 0x151   :  { %v350_v36 = vadd.bf16 %v3706_v44, %v294_v31  ;;  %1308 = vmatprep.subr.bf16.mxu1 %v3283_v28  ;;  %v3284_v44 = vld [vmem:[#allocation5 + $0x1c0] ss:$16 sps:$4 sm:$0xff]  }
 0x152   :  { %v351_v49 = vadd.bf16 %v3709_v47, %v295_v33  ;;  %1190 = vmatpush1.bf16.msra.mxu0 %v3284_v44  ;;  %v3292_v47 = vld [vmem:[#allocation5 + $0x1e4] ss:$16 sps:$4 sm:$0xff]   ;;  %v3311_v44 = vld [vmem:[#allocation7 + $0x50] ss:$8 sps:$4 sm:$0xff]  }
 0x153   :  { %v368_v40 = vmax.bf16 %v3509_v0, %v350_v36  ;;  %1191 = vmatprep.subr.bf16.mxu0 %v3292_v47  ;;  %v3308_v36 = vld [vmem:[#allocation7 + $0x40] ss:$8 sps:$4 sm:$0xff]   ;;  %v3316_v47 = vld [vmem:[#allocation7 + $0x64] ss:$8 sps:$4 sm:$0xff]  }
 0x154   :  { %v369_v37 = vmax.bf16 %v3509_v0, %v351_v49  ;;  %1309 = vmatpush1.bf16.msra.mxu1 %v3281_v35 }
 0x155   :  { %1310 = vmatprep.subr.bf16.mxu1 %v3289_v43 }
 0x156   :  { %666 = vmatprep.mubr.bf16.mxu1 %v369_v37  ;;  %1192 = vmatpush1.bf16.msra.mxu0 %v3290_v48 }
 0x157   :  { %667 = vmatmul.mubr.bf16.gmra.mrb[32].mxu1 %v368_v40  ;;  %1949 = vmatprep.subr.bf16.mxu0 %v3298_v51  ;;  %v3314_v51 = vld [vmem:[#allocation7 + $0x60] ss:$8 sps:$4 sm:$0xff]  }
 0x158   :  { %676 = vmatprep.mubr.bf16.mxu1 %v371_v38  ;;  %1311 = vmatpush1.bf16.msra.mxu1 %v3287_v45  ;;  %v3313_v38 = vld [vmem:[#allocation7 + $0x54] ss:$8 sps:$4 sm:$0xff]  }
 0x159   :  { %1312 = vmatprep.subr.bf16.mxu1 %v3295_v46 }
 0x15c   :  { %1313 = vmatpush1.bf16.msra.mxu1 %v3293_v50 }
 0x15f   :  { %677 = vmatmul.mubr.bf16.gmra.mrb[36].mxu1 %v370_v41 }
 0x1f2   :  { %v598_v58 = vpop.f32.mrb[4].mxu1 }
 0x1f3   :  { %v600_v59 = vpop.f32.mrb[5].mxu1 }
 0x1f4   :  { %v602_v61 = vpop.f32.mrb[6].mxu1 }
 0x1f5   :  { %v685_v63 = vpack.c.bf16 %v602_v61, %v598_v58  ;;  %v604_v1 = vpop.f32.mrb[7].mxu1 }
 0x1f6   :  { %v686_v2 = vpack.c.bf16 %v604_v1, %v600_v59  ;;  %v3317_v59 = vld [vmem:[#allocation7 + $0x70] ss:$8 sps:$4 sm:$0xff]  }
 0x1f7   :  { %v741_v3 = vadd.bf16 %v3760_v60, %v685_v63  ;;  %v3322_v63 = vld [vmem:[#allocation7 + $0x84] ss:$8 sps:$4 sm:$0xff]  }
 0x1f8   :  { %v742_v4 = vadd.bf16 %v3763_v62, %v686_v2 }
 0x1f9   :  { %v759_v8 = vmax.bf16 %v3509_v0, %v741_v3 }
 0x1fa   :  { %v608_v5 = vpop.f32.mrb[8].mxu1  ;;  %v760_v6 = vmax.bf16 %v3509_v0, %v742_v4  ;;  %v3320_v4 = vld [vmem:[#allocation7 + $0x80] ss:$8 sps:$4 sm:$0xff]  }
 0x1fb   :  { %v610_v9 = vpop.f32.mrb[9].mxu1 }
 0x1fc   :  { %v612_v11 = vpop.f32.mrb[10].mxu1  ;;  %1193 = vmatprep.mubr.bf16.mxu0 %v760_v6  ;;  %1314 = vmatprep.mubr.bf16.mxu1 %v760_v6 }
 0x1fd   :  { %v687_v12 = vpack.c.bf16 %v612_v11, %v608_v5  ;;  %v614_v13 = vpop.f32.mrb[11].mxu1  ;;  %1194 = vmatmul.mubr.bf16.vlgmr.msra.gmra.mrb[32].mxu0 %v759_v8  ;;  %1315 = vmatmul.mubr.bf16.vlgmr.msra.gmra.mrb[40].mxu1 %v759_v8 }
 0x1fe   :  { %v688_v14 = vpack.c.bf16 %v614_v13, %v610_v9  ;;  %1950 = vmatpush1.bf16.msra.mxu0 %v3296_v7  ;;  %v3325_v7 = vld [vmem:[#allocation7 + $0x94] ss:$8 sps:$4 sm:$0xff]  }
 0x1ff   :  { %v743_v16 = vadd.bf16 %v3760_v60, %v687_v12  ;;  %1951 = vmatprep.subr.bf16.mxu0 %v3301_v10  ;;  %v3323_v12 = vld [vmem:[#allocation7 + $0x90] ss:$8 sps:$4 sm:$0xff]  }
 0x200   :  { %v744_v18 = vadd.bf16 %v3763_v62, %v688_v14  ;;  %v3328_v14 = vld [vmem:[#allocation7 + $0xa4] ss:$8 sps:$4 sm:$0xff]  }
 0x201   :  { %v761_v23 = vmax.bf16 %v3509_v0, %v743_v16 }
 0x202   :  { %v618_v19 = vpop.f32.mrb[12].mxu1  ;;  %v762_v20 = vmax.bf16 %v3509_v0, %v744_v18  ;;  %1952 = vmatpush1.bf16.msra.mxu0 %v3299_v15  ;;  %v3326_v18 = vld [vmem:[#allocation7 + $0xa0] ss:$8 sps:$4 sm:$0xff]  }
 0x203   :  { %v620_v22 = vpop.f32.mrb[13].mxu1  ;;  %1953 = vmatprep.subr.bf16.mxu0 %v3304_v17 }
 0x204   :  { %v622_v25 = vpop.f32.mrb[14].mxu1  ;;  %1203 = vmatprep.mubr.bf16.mxu0 %v762_v20  ;;  %1324 = vmatprep.mubr.bf16.mxu1 %v762_v20 }
 0x205   :  { %v689_v26 = vpack.c.bf16 %v622_v25, %v618_v19  ;;  %v624_v27 = vpop.f32.mrb[15].mxu1  ;;  %1204 = vmatmul.mubr.bf16.gmra.mrb[36].mxu0 %v761_v23  ;;  %1325 = vmatmul.mubr.bf16.gmra.mrb[44].mxu1 %v761_v23 }
 0x206   :  { %v690_v28 = vpack.c.bf16 %v624_v27, %v620_v22  ;;  %1954 = vmatpush1.bf16.msra.mxu0 %v3302_v21  ;;  %v3331_v21 = vld [vmem:[#allocation7 + $0xb4] ss:$8 sps:$4 sm:$0xff]  }
 0x207   :  { %v745_v31 = vadd.bf16 %v3760_v60, %v689_v26  ;;  %1955 = vmatprep.subr.bf16.mxu0 %v3307_v24  ;;  %v3329_v26 = vld [vmem:[#allocation7 + $0xb0] ss:$8 sps:$4 sm:$0xff]  }
 0x208   :  { %v746_v33 = vadd.bf16 %v3763_v62, %v690_v28  ;;  %v3334_v28 = vld [vmem:[#allocation7 + $0xc4] ss:$8 sps:$4 sm:$0xff]  }
 0x209   :  { %v763_v37 = vmax.bf16 %v3509_v0, %v745_v31 }
 0x20a   :  { %v628_v34 = vpop.f32.mrb[16].mxu1  ;;  %v764_v35 = vmax.bf16 %v3509_v0, %v746_v33  ;;  %1956 = vmatpush1.bf16.msra.mxu0 %v3305_v29  ;;  %v3332_v33 = vld [vmem:[#allocation7 + $0xc0] ss:$8 sps:$4 sm:$0xff]  }
 0x20b   :  { %v630_v49 = vpop.f32.mrb[17].mxu1  ;;  %1957 = vmatprep.subr.bf16.mxu0 %v3310_v32 }
 0x20c   :  { %v632_v40 = vpop.f32.mrb[18].mxu1  ;;  %1213 = vmatprep.mubr.bf16.mxu0 %v764_v35  ;;  %1334 = vmatprep.mubr.bf16.mxu1 %v764_v35 }
 0x20d   :  { %v691_v41 = vpack.c.bf16 %v632_v40, %v628_v34  ;;  %v634_v42 = vpop.f32.mrb[19].mxu1  ;;  %1214 = vmatmul.mubr.bf16.gmra.mrb[40].mxu0 %v763_v37  ;;  %1335 = vmatmul.mubr.bf16.gmra.mrb[48].mxu1 %v763_v37 }
 0x20e   :  { %v692_v43 = vpack.c.bf16 %v634_v42, %v630_v49  ;;  %1958 = vmatpush1.bf16.msra.mxu0 %v3308_v36  ;;  %v3337_v36 = vld [vmem:[#allocation7 + $0xd4] ss:$8 sps:$4 sm:$0xff]  }
 0x20f   :  { %v747_v45 = vadd.bf16 %v3760_v60, %v691_v41  ;;  %1959 = vmatprep.subr.bf16.mxu0 %v3313_v38  ;;  %v3335_v41 = vld [vmem:[#allocation7 + $0xd0] ss:$8 sps:$4 sm:$0xff]  }
 0x210   :  { %v748_v46 = vadd.bf16 %v3763_v62, %v692_v43 }
 0x211   :  { %v765_v52 = vmax.bf16 %v3509_v0, %v747_v45 }
 0x212   :  { %v638_v48 = vpop.f32.mrb[20].mxu1  ;;  %v766_v50 = vmax.bf16 %v3509_v0, %v748_v46  ;;  %1960 = vmatpush1.bf16.msra.mxu0 %v3311_v44 }
 0x213   :  { %v640_v54 = vpop.f32.mrb[21].mxu1  ;;  %1961 = vmatprep.subr.bf16.mxu0 %v3316_v47 }
 0x214   :  { %v642_v55 = vpop.f32.mrb[22].mxu1  ;;  %1223 = vmatprep.mubr.bf16.mxu0 %v766_v50  ;;  %1344 = vmatprep.mubr.bf16.mxu1 %v766_v50 }
 0x215   :  { %v693_v56 = vpack.c.bf16 %v642_v55, %v638_v48  ;;  %v644_v57 = vpop.f32.mrb[23].mxu1  ;;  %1224 = vmatmul.mubr.bf16.gmra.mrb[44].mxu0 %v765_v52  ;;  %1345 = vmatmul.mubr.bf16.gmra.mrb[52].mxu1 %v765_v52 }
 0x216   :  { %v694_v58 = vpack.c.bf16 %v644_v57, %v640_v54  ;;  %1962 = vmatpush1.bf16.msra.mxu0 %v3314_v51  ;;  %v3338_v57 = vld [vmem:[#allocation7 + $0xe0] ss:$8 sps:$4 sm:$0xff]  }
 0x217   :  { %v749_v61 = vadd.bf16 %v3760_v60, %v693_v56  ;;  %1963 = vmatprep.subr.bf16.mxu0 %v3319_v53 }
 0x218   :  { %v750_v1 = vadd.bf16 %v3763_v62, %v694_v58  ;;  %v3340_v58 = vld [vmem:[#allocation7 + $0xe4] ss:$8 sps:$4 sm:$0xff]  }
 0x219   :  { %v767_v6 = vmax.bf16 %v3509_v0, %v749_v61  ;;  %v3341_v61 = vld [vmem:[#allocation7 + $0xf0] ss:$8 sps:$4 sm:$0xff]  }
 0x21a   :  { %v648_v2 = vpop.f32.mrb[24].mxu1  ;;  %v768_v3 = vmax.bf16 %v3509_v0, %v750_v1  ;;  %1964 = vmatpush1.bf16.msra.mxu0 %v3317_v59  ;;  %v3343_v59 = vld [vmem:[#allocation7 + $0xf4] ss:$8 sps:$4 sm:$0xff]  }
 0x21b   :  { %v650_v5 = vpop.f32.mrb[25].mxu1  ;;  %1965 = vmatprep.subr.bf16.mxu0 %v3322_v63 }
 0x21c   :  { %v652_v8 = vpop.f32.mrb[26].mxu1  ;;  %1233 = vmatprep.mubr.bf16.mxu0 %v768_v3  ;;  %1354 = vmatprep.mubr.bf16.mxu1 %v768_v3 }
 0x21d   :  { %v695_v9 = vpack.c.bf16 %v652_v8, %v648_v2  ;;  %v654_v10 = vpop.f32.mrb[27].mxu1  ;;  %1234 = vmatmul.mubr.bf16.gmra.mrb[48].mxu0 %v767_v6  ;;  %1355 = vmatmul.mubr.bf16.gmra.mrb[56].mxu1 %v767_v6 }
 0x21e   :  { %v696_v11 = vpack.c.bf16 %v654_v10, %v650_v5  ;;  %1966 = vmatpush1.bf16.msra.mxu0 %v3320_v4 }
 0x21f   :  { %v751_v13 = vadd.bf16 %v3760_v60, %v695_v9  ;;  %1967 = vmatprep.subr.bf16.mxu0 %v3325_v7 }
 0x220   :  { %v752_v15 = vadd.bf16 %v3763_v62, %v696_v11 }
 0x221   :  { %v769_v20 = vmax.bf16 %v3509_v0, %v751_v13 }
 0x222   :  { %v658_v16 = vpop.f32.mrb[28].mxu1  ;;  %v770_v17 = vmax.bf16 %v3509_v0, %v752_v15  ;;  %1968 = vmatpush1.bf16.msra.mxu0 %v3323_v12 }
 0x223   :  { %v660_v19 = vpop.f32.mrb[29].mxu1  ;;  %1969 = vmatprep.subr.bf16.mxu0 %v3328_v14 }
 0x224   :  { %v662_v22 = vpop.f32.mrb[30].mxu1  ;;  %1243 = vmatprep.mubr.bf16.mxu0 %v770_v17  ;;  %1364 = vmatprep.mubr.bf16.mxu1 %v770_v17 }
 0x225   :  { %v697_v23 = vpack.c.bf16 %v662_v22, %v658_v16  ;;  %v664_v24 = vpop.f32.mrb[31].mxu1  ;;  %1244 = vmatmul.mubr.bf16.gmra.mrb[52].mxu0 %v769_v20  ;;  %1365 = vmatmul.mubr.bf16.gmra.mrb[60].mxu1 %v769_v20 }
 0x226   :  { %v698_v25 = vpack.c.bf16 %v664_v24, %v660_v19  ;;  %1970 = vmatpush1.bf16.msra.mxu0 %v3326_v18 }
 0x227   :  { %v753_v27 = vadd.bf16 %v3760_v60, %v697_v23  ;;  %1971 = vmatprep.subr.bf16.mxu0 %v3331_v21 }
 0x228   :  { %v754_v29 = vadd.bf16 %v3763_v62, %v698_v25 }
 0x229   :  { %v771_v35 = vmax.bf16 %v3509_v0, %v753_v27 }
 0x22a   :  { %v668_v31 = vpop.f32.mrb[32].mxu1  ;;  %v772_v32 = vmax.bf16 %v3509_v0, %v754_v29  ;;  %1972 = vmatpush1.bf16.msra.mxu0 %v3329_v26 }
 0x22b   :  { %v670_v34 = vpop.f32.mrb[33].mxu1  ;;  %1973 = vmatprep.subr.bf16.mxu0 %v3334_v28 }
 0x22c   :  { %v672_v49 = vpop.f32.mrb[34].mxu1  ;;  %1253 = vmatprep.mubr.bf16.mxu0 %v772_v32  ;;  %1374 = vmatprep.mubr.bf16.mxu1 %v772_v32 }
 0x22d   :  { %v699_v37 = vpack.c.bf16 %v672_v49, %v668_v31  ;;  %v674_v38 = vpop.f32.mrb[35].mxu1  ;;  %1254 = vmatmul.mubr.bf16.gmra.mrb[56].mxu0 %v771_v35  ;;  %1375 = vmatmul.mubr.bf16.gmra.mrb[64].mxu1 %v771_v35  ;;  %v3349_v49 = vld [vmem:[#allocation7 + $0x114] ss:$8 sps:$4 sm:$0xff]  }
 0x22e   :  { %v700_v40 = vpack.c.bf16 %v674_v38, %v670_v34  ;;  %1974 = vmatpush1.bf16.msra.mxu0 %v3332_v33  ;;  %v3344_v33 = vld [vmem:[#allocation7 + $0x100] ss:$8 sps:$4 sm:$0xff]  }
 0x22f   :  { %v755_v42 = vadd.bf16 %v3760_v60, %v699_v37  ;;  %1975 = vmatprep.subr.bf16.mxu0 %v3337_v36 }
 0x230   :  { %v756_v43 = vadd.bf16 %v3763_v62, %v700_v40 }
 0x231   :  { %v773_v48 = vmax.bf16 %v3509_v0, %v755_v42 }
 0x232   :  { %v678_v44 = vpop.f32.mrb[36].mxu1  ;;  %v774_v45 = vmax.bf16 %v3509_v0, %v756_v43  ;;  %1976 = vmatpush1.bf16.msra.mxu0 %v3335_v41 }
 0x233   :  { %v701_v47 = vpack.c.bf16 %v678_v44, %v678_v44  ;;  %v680_v46 = vpop.f32.mrb[37].mxu1  ;;  %1977 = vmatprep.subr.bf16.mxu0 %v3340_v58 }
 0x234   :  { %v702_v50 = vpack.c.bf16 %v680_v46, %v680_v46  ;;  %v682_v51 = vpop.f32.mrb[38].mxu1  ;;  %1263 = vmatprep.mubr.bf16.mxu0 %v774_v45  ;;  %1384 = vmatprep.mubr.bf16.mxu1 %v774_v45 }
 0x235   :  { %v757_v54 = vadd.bf16 %v3760_v60, %v701_v47  ;;  %v683_v52 = vpop.f32.mrb[39].mxu1  ;;  %1264 = vmatmul.mubr.bf16.gmra.mrb[60].mxu0 %v773_v48  ;;  %1385 = vmatmul.mubr.bf16.gmra.mrb[68].mxu1 %v773_v48  ;;  %v3346_v60 = vld [vmem:[#allocation7 + $0x104] ss:$8 sps:$4 sm:$0xff]   ;;  %v3347_v47 = vld [vmem:[#allocation7 + $0x110] ss:$8 sps:$4 sm:$0xff]  }
 0x236   :  { %v758_v53 = vadd.bf16 %v3763_v62, %v702_v50  ;;  %1978 = vmatpush1.bf16.msra.mxu0 %v3338_v57  ;;  %v2940_v62 = vld.sshfl [vmem:[%s4178_s6] sm:$0x33 pattern:$0x75316420]  ;;  %v3352_v50 = vld [vmem:[#allocation7 + $0x124] ss:$8 sps:$4 sm:$0xff]  }
 0x237   :  { %v775_v56 = vmax.bf16 %v3509_v0, %v757_v54  ;;  %1979 = vmatprep.subr.bf16.mxu0 %v3343_v59  ;;  %v1448_v63 = vcombine.high %v2940_v62, %v2940_v62  ;;  %v1455_v1 = vrot.slane %v2940_v62, %v3699_v30 }
 0x238   :  { %v776_v55 = vmax.bf16 %v3509_v0, %v758_v53 }
 0x239   :  { %v1462_v2 = vrot.slane %v1448_v63, %v3699_v30  ;;  %v1463_v3 = vcombine.high %v1455_v1, %v1455_v1  ;;  %v1466_v5 = vpack.i.b16 %v1455_v1, %v1455_v1 }
 0x23a   :  { %1273 = vmatprep.mubr.bf16.mxu0 %v776_v55  ;;  %1394 = vmatprep.mubr.bf16.mxu1 %v776_v55 }
 0x23b   :  { %1980 = vmatpush1.bf16.msra.mxu0 %v3341_v61  ;;  %v1464_v4 = vcombine.high %v1462_v2, %v1462_v2  ;;  %v1480_v6 = vpack.i.b16 %v1463_v3, %v1463_v3  ;;  %v1473_v7 = vpack.i.b16 %v1462_v2, %v1462_v2  ;;  %v3807_v13 = vrot.slane %v1466_v5, %v3703_v39  ;;  %v3355_v61 = vld [vmem:[#allocation7 + $0x134] ss:$8 sps:$4 sm:$0xff]  }
 0x23c   :  { %2070 = vmatprep.subr.bf16.mxu0 %v3346_v60  ;;  %v3393_v5 = vld [vmem:[%s4181_s9] sm:$0xff]  }
 0x23d   :  { %1274 = vmatmul.mubr.bf16.gmra.mrb[64].mxu0 %v775_v56  ;;  %1395 = vmatmul.mubr.bf16.gmra.mrb[72].mxu1 %v775_v56  ;;  %v1487_v8 = vpack.i.b16 %v1464_v4, %v1464_v4  ;;  %v3810_v14 = vrot.slane %v1480_v6, %v3703_v39  ;;  %v3813_v17 = vrot.slane %v1473_v7, %v3703_v39  ;;  %v3350_v56 = vld [vmem:[#allocation7 + $0x120] ss:$8 sps:$4 sm:$0xff]   ;;  %v3392_v4 = vld [vmem:[%s4181_s9 + $0x40] sm:$0xff]  }
 0x23e   :  { %v3394_v6 = vld [vmem:[%s4181_s9 + $0x48] sm:$0xff]   ;;  %3023 = vmatprep.subr.bf16.mxu1 %v3392_v4 }
 0x23f   :  { %v3816_v18 = vrot.slane %v1487_v8, %v3703_v39  ;;  %3024 = vmatpush3.bf16.msra.mxu1 %v3393_v5  ;;  %v3402_v5 = vld [vmem:[%s4181_s9 + $0x68] sm:$0xff]  }
 0x240   :  { %3025 = vmatprep.subr.bf16.mxu1 %v3394_v6 }
 0x2d0   :  { %v1195_v9 = vpop.f32.mrb[32].mxu0  ;;  %v1316_v10 = vpop.f32.mrb[40].mxu1 }
 0x2d1   :  { %v1197_v11 = vpop.f32.mrb[33].mxu0  ;;  %v1318_v12 = vpop.f32.mrb[41].mxu1 }
 0x2d2   :  { %v1199_v15 = vpop.f32.mrb[34].mxu0  ;;  %v1320_v16 = vpop.f32.mrb[42].mxu1 }
 0x2d3   :  { %v1403_v19 = vpack.c.bf16 %v1199_v15, %v1195_v9  ;;  %v1405_v20 = vpack.c.bf16 %v1320_v16, %v1316_v10  ;;  %v1201_v21 = vpop.f32.mrb[35].mxu0  ;;  %v1322_v22 = vpop.f32.mrb[43].mxu1  ;;  %v3353_v9 = vld [vmem:[#allocation7 + $0x130] ss:$8 sps:$4 sm:$0xff]  }
 0x2d4   :  { %v1404_v23 = vpack.c.bf16 %v1201_v21, %v1197_v11  ;;  %v1406_v24 = vpack.c.bf16 %v1322_v22, %v1318_v12  ;;  %v3358_v12 = vld [vmem:[#allocation7 + $0x144] ss:$8 sps:$4 sm:$0xff]  }
 0x2d5   :  { %v1493_v25 = vadd.bf16 %v3807_v13, %v1403_v19  ;;  %v3820_v26 = vadd.bf16 %v3810_v14, %v1405_v20  ;;  %v3395_v19 = vld [vmem:[%s4181_s9 + $0x8] sm:$0xff]   ;;  %v3396_v20 = vld [vmem:[%s4181_s9 + $0x50] sm:$0xff]  }
 0x2d6   :  { %v1494_v27 = vadd.bf16 %v3813_v17, %v1404_v23  ;;  %v3824_v28 = vadd.bf16 %v3816_v18, %v1406_v24  ;;  %v3356_v24 = vld [vmem:[#allocation7 + $0x140] ss:$8 sps:$4 sm:$0xff]   ;;  %3026 = vmatpush3.bf16.msra.mxu1 %v3395_v19 }
 0x2d7   :  { %v1529_v34 = vmax.bf16 %v3509_v0, %v1493_v25  ;;  %3027 = vmatprep.subr.bf16.mxu1 %v3396_v20  ;;  %v3403_v20 = vld [vmem:[%s4181_s9 + $0x28] sm:$0xff]  }
 0x2d8   :  { %v1205_v29 = vpop.f32.mrb[36].mxu0  ;;  %v1326_v31 = vpop.f32.mrb[44].mxu1  ;;  %v1530_v32 = vmax.bf16 %v3509_v0, %v1494_v27 }
 0x2d9   :  { %v1207_v35 = vpop.f32.mrb[37].mxu0  ;;  %v1328_v36 = vpop.f32.mrb[45].mxu1 }
 0x2da   :  { %v1209_v37 = vpop.f32.mrb[38].mxu0  ;;  %v1330_v38 = vpop.f32.mrb[46].mxu1  ;;  %1981 = vmatprep.mubr.bf16.mxu0 %v1530_v32 }
 0x2db   :  { %v1407_v40 = vpack.c.bf16 %v1209_v37, %v1205_v29  ;;  %v1409_v41 = vpack.c.bf16 %v1330_v38, %v1326_v31  ;;  %v1211_v42 = vpop.f32.mrb[39].mxu0  ;;  %v1332_v43 = vpop.f32.mrb[47].mxu1  ;;  %1982 = vmatmul.mubr.bf16.vlgmr.msra.gmra.mrb[68].mxu0 %v1529_v34  ;;  %v3361_v31 = vld [vmem:[#allocation7 + $0x154] ss:$8 sps:$4 sm:$0xff]   ;;  %v3397_v34 = vld [vmem:[%s4181_s9 + $0x10] sm:$0xff]  }
 0x2dc   :  { %v1408_v44 = vpack.c.bf16 %v1211_v42, %v1207_v35  ;;  %v1410_v45 = vpack.c.bf16 %v1332_v43, %v1328_v36  ;;  %2071 = vmatpush1.bf16.msra.mxu0 %v3344_v33  ;;  %v3398_v38 = vld [vmem:[%s4181_s9 + $0x58] sm:$0xff]   ;;  %3028 = vmatpush3.bf16.msra.mxu1 %v3397_v34 }
 0x2dd   :  { %v1497_v46 = vadd.bf16 %v3807_v13, %v1407_v40  ;;  %v3830_v48 = vadd.bf16 %v3810_v14, %v1409_v41  ;;  %2072 = vmatprep.subr.bf16.mxu0 %v3349_v49  ;;  %v3359_v42 = vld [vmem:[#allocation7 + $0x150] ss:$8 sps:$4 sm:$0xff]   ;;  %3029 = vmatprep.subr.bf16.mxu1 %v3398_v38 }
 0x2de   :  { %v1498_v51 = vadd.bf16 %v3813_v17, %v1408_v44  ;;  %v3834_v54 = vadd.bf16 %v3816_v18, %v1410_v45  ;;  %v3364_v45 = vld [vmem:[#allocation7 + $0x164] ss:$8 sps:$4 sm:$0xff]  }
 0x2df   :  { %v1533_v59 = vmax.bf16 %v3509_v0, %v1497_v46 }
 0x2e0   :  { %v1215_v52 = vpop.f32.mrb[40].mxu0  ;;  %v1336_v53 = vpop.f32.mrb[48].mxu1  ;;  %2073 = vmatpush1.bf16.msra.mxu0 %v3347_v47  ;;  %v1534_v55 = vmax.bf16 %v3509_v0, %v1498_v51  ;;  %v3400_v51 = vld [vmem:[%s4181_s9 + $0x60] sm:$0xff]  }
 0x2e1   :  { %v1217_v57 = vpop.f32.mrb[41].mxu0  ;;  %v1338_v58 = vpop.f32.mrb[49].mxu1  ;;  %2074 = vmatprep.subr.bf16.mxu0 %v3352_v50  ;;  %v3399_v50 = vld [vmem:[%s4181_s9 + $0x18] sm:$0xff]  }
 0x2e2   :  { %v1219_v60 = vpop.f32.mrb[42].mxu0  ;;  %v1340_v62 = vpop.f32.mrb[50].mxu1  ;;  %1991 = vmatprep.mubr.bf16.mxu0 %v1534_v55  ;;  %3030 = vmatpush3.bf16.msra.mxu1 %v3399_v50 }
 0x2e3   :  { %v1411_v63 = vpack.c.bf16 %v1219_v60, %v1215_v52  ;;  %v1413_v1 = vpack.c.bf16 %v1340_v62, %v1336_v53  ;;  %v1221_v2 = vpop.f32.mrb[43].mxu0  ;;  %v1342_v3 = vpop.f32.mrb[51].mxu1  ;;  %1992 = vmatmul.mubr.bf16.gmra.mrb[72].mxu0 %v1533_v59  ;;  %3031 = vmatprep.subr.bf16.mxu1 %v3400_v51 }
 0x2e4   :  { %v1412_v7 = vpack.c.bf16 %v1221_v2, %v1217_v57  ;;  %v1414_v8 = vpack.c.bf16 %v1342_v3, %v1338_v58  ;;  %2075 = vmatpush1.bf16.msra.mxu0 %v3350_v56  ;;  %v3362_v56 = vld [vmem:[#allocation7 + $0x160] ss:$8 sps:$4 sm:$0xff]  }
 0x2e5   :  { %v1501_v10 = vadd.bf16 %v3807_v13, %v1411_v63  ;;  %v3849_v11 = vadd.bf16 %v3810_v14, %v1413_v1  ;;  %2076 = vmatprep.subr.bf16.mxu0 %v3355_v61  ;;  %v3367_v61 = vld [vmem:[#allocation7 + $0x174] ss:$8 sps:$4 sm:$0xff]  }
 0x2e6   :  { %v1502_v15 = vadd.bf16 %v3813_v17, %v1412_v7  ;;  %v3853_v16 = vadd.bf16 %v3816_v18, %v1414_v8  ;;  %v3401_v63 = vld [vmem:[%s4181_s9 + $0x20] sm:$0xff]  }
 0x2e7   :  { %v1537_v29 = vmax.bf16 %v3509_v0, %v1501_v10  ;;  %v3365_v8 = vld [vmem:[#allocation7 + $0x170] ss:$8 sps:$4 sm:$0xff]   ;;  %3032 = vmatpush3.bf16.msra.mxu1 %v3401_v63 }
 0x2e8   :  { %v1225_v21 = vpop.f32.mrb[44].mxu0  ;;  %v1346_v22 = vpop.f32.mrb[52].mxu1  ;;  %2077 = vmatpush1.bf16.msra.mxu0 %v3353_v9  ;;  %v1538_v23 = vmax.bf16 %v3509_v0, %v1502_v15  ;;  %3033 = vmatprep.subr.bf16.mxu1 %v3402_v5 }
 0x2e9   :  { %v1227_v25 = vpop.f32.mrb[45].mxu0  ;;  %v1348_v27 = vpop.f32.mrb[53].mxu1  ;;  %2078 = vmatprep.subr.bf16.mxu0 %v3358_v12  ;;  %v3370_v12 = vld [vmem:[#allocation7 + $0x184] ss:$8 sps:$4 sm:$0xff]  }
 0x2ea   :  { %v1229_v32 = vpop.f32.mrb[46].mxu0  ;;  %v1350_v33 = vpop.f32.mrb[54].mxu1  ;;  %2001 = vmatprep.mubr.bf16.mxu0 %v1538_v23 }
 0x2eb   :  { %v1415_v35 = vpack.c.bf16 %v1229_v32, %v1225_v21  ;;  %v1417_v36 = vpack.c.bf16 %v1350_v33, %v1346_v22  ;;  %v1231_v49 = vpop.f32.mrb[47].mxu0  ;;  %v1352_v37 = vpop.f32.mrb[55].mxu1  ;;  %2002 = vmatmul.mubr.bf16.gmra.mrb[76].mxu0 %v1537_v29  ;;  %v3404_v21 = vld [vmem:[%s4181_s9 + $0x70] sm:$0xff]   ;;  %v3373_v32 = vld [vmem:[#allocation7 + $0x194] ss:$8 sps:$4 sm:$0xff]   ;;  %3034 = vmatpush3.bf16.msra.mxu1 %v3403_v20 }
 0x2ec   :  { %v1416_v40 = vpack.c.bf16 %v1231_v49, %v1227_v25  ;;  %v1418_v41 = vpack.c.bf16 %v1352_v37, %v1348_v27  ;;  %2079 = vmatpush1.bf16.msra.mxu0 %v3356_v24  ;;  %v3368_v25 = vld [vmem:[#allocation7 + $0x180] ss:$8 sps:$4 sm:$0xff]   ;;  %3035 = vmatprep.subr.bf16.mxu1 %v3404_v21 }
 0x2ed   :  { %v1505_v43 = vadd.bf16 %v3807_v13, %v1415_v35  ;;  %v3871_v44 = vadd.bf16 %v3810_v14, %v1417_v36  ;;  %2080 = vmatprep.subr.bf16.mxu0 %v3361_v31  ;;  %v3405_v35 = vld [vmem:[%s4181_s9 + $0x30] sm:$0xff]  }
 0x2ee   :  { %v1506_v47 = vadd.bf16 %v3813_v17, %v1416_v40  ;;  %v3875_v46 = vadd.bf16 %v3816_v18, %v1418_v41 }
 0x2ef   :  { %v1541_v59 = vmax.bf16 %v3509_v0, %v1505_v43  ;;  %3036 = vmatpush3.bf16.msra.mxu1 %v3405_v35 }
 0x2f0   :  { %v1235_v52 = vpop.f32.mrb[48].mxu0  ;;  %v1356_v53 = vpop.f32.mrb[56].mxu1  ;;  %v1542_v55 = vmax.bf16 %v3509_v0, %v1506_v47  ;;  %2081 = vmatpush1.bf16.msra.mxu0 %v3359_v42  ;;  %v3371_v42 = vld [vmem:[#allocation7 + $0x190] ss:$8 sps:$4 sm:$0xff]   ;;  %v3376_v47 = vld [vmem:[#allocation7 + $0x1a4] ss:$8 sps:$4 sm:$0xff]  }
 0x2f1   :  { %v1237_v57 = vpop.f32.mrb[49].mxu0  ;;  %v1358_v58 = vpop.f32.mrb[57].mxu1  ;;  %2082 = vmatprep.subr.bf16.mxu0 %v3364_v45 }
 0x2f2   :  { %v1239_v60 = vpop.f32.mrb[50].mxu0  ;;  %v1360_v62 = vpop.f32.mrb[58].mxu1  ;;  %2011 = vmatprep.mubr.bf16.mxu0 %v1542_v55 }
 0x2f3   :  { %v1419_v1 = vpack.c.bf16 %v1239_v60, %v1235_v52  ;;  %v1421_v2 = vpack.c.bf16 %v1360_v62, %v1356_v53  ;;  %v1241_v3 = vpop.f32.mrb[51].mxu0  ;;  %v1362_v4 = vpop.f32.mrb[59].mxu1  ;;  %2012 = vmatmul.mubr.bf16.gmra.mrb[80].mxu0 %v1541_v59 }
 0x2f4   :  { %v1420_v6 = vpack.c.bf16 %v1241_v3, %v1237_v57  ;;  %v1422_v7 = vpack.c.bf16 %v1362_v4, %v1358_v58  ;;  %2083 = vmatpush1.bf16.msra.mxu0 %v3362_v56  ;;  %v3374_v56 = vld [vmem:[#allocation7 + $0x1a0] ss:$8 sps:$4 sm:$0xff]  }
 0x2f5   :  { %v1509_v9 = vadd.bf16 %v3807_v13, %v1419_v1  ;;  %v3893_v10 = vadd.bf16 %v3810_v14, %v1421_v2  ;;  %2084 = vmatprep.subr.bf16.mxu0 %v3367_v61  ;;  %v3379_v61 = vld [vmem:[#allocation7 + $0x1b4] ss:$8 sps:$4 sm:$0xff]  }
 0x2f6   :  { %v1510_v15 = vadd.bf16 %v3813_v17, %v1420_v6  ;;  %v3897_v19 = vadd.bf16 %v3816_v18, %v1422_v7  ;;  %v3377_v6 = vld [vmem:[#allocation7 + $0x1b0] ss:$8 sps:$4 sm:$0xff]  }
 0x2f7   :  { %v1545_v31 = vmax.bf16 %v3509_v0, %v1509_v9  ;;  %v3382_v9 = vld [vmem:[#allocation7 + $0x1c4] ss:$8 sps:$4 sm:$0xff]  }
 0x2f8   :  { %v1245_v22 = vpop.f32.mrb[52].mxu0  ;;  %v1366_v23 = vpop.f32.mrb[60].mxu1  ;;  %v1546_v24 = vmax.bf16 %v3509_v0, %v1510_v15  ;;  %2085 = vmatpush1.bf16.msra.mxu0 %v3365_v8 }
 0x2f9   :  { %v1247_v27 = vpop.f32.mrb[53].mxu0  ;;  %v1368_v29 = vpop.f32.mrb[61].mxu1  ;;  %2086 = vmatprep.subr.bf16.mxu0 %v3370_v12 }
 0x2fa   :  { %v1249_v33 = vpop.f32.mrb[54].mxu0  ;;  %v1370_v34 = vpop.f32.mrb[62].mxu1  ;;  %2021 = vmatprep.mubr.bf16.mxu0 %v1546_v24 }
 0x2fb   :  { %v1423_v36 = vpack.c.bf16 %v1249_v33, %v1245_v22  ;;  %v1425_v49 = vpack.c.bf16 %v1370_v34, %v1366_v23  ;;  %v1251_v37 = vpop.f32.mrb[55].mxu0  ;;  %v1372_v38 = vpop.f32.mrb[63].mxu1  ;;  %2022 = vmatmul.mubr.bf16.gmra.mrb[84].mxu0 %v1545_v31  ;;  %v3380_v23 = vld [vmem:[#allocation7 + $0x1c0] ss:$8 sps:$4 sm:$0xff]  }
 0x2fc   :  { %v1424_v40 = vpack.c.bf16 %v1251_v37, %v1247_v27  ;;  %v1426_v41 = vpack.c.bf16 %v1372_v38, %v1368_v29  ;;  %2087 = vmatpush1.bf16.msra.mxu0 %v3368_v25  ;;  %v3385_v29 = vld [vmem:[#allocation7 + $0x1d4] ss:$8 sps:$4 sm:$0xff]   ;;  %v3383_v38 = vld [vmem:[#allocation7 + $0x1d0] ss:$8 sps:$4 sm:$0xff]  }
 0x2fd   :  { %v1513_v43 = vadd.bf16 %v3807_v13, %v1423_v36  ;;  %v3912_v45 = vadd.bf16 %v3810_v14, %v1425_v49  ;;  %2088 = vmatprep.subr.bf16.mxu0 %v3373_v32 }
 0x2fe   :  { %v1514_v50 = vadd.bf16 %v3813_v17, %v1424_v40  ;;  %v3916_v51 = vadd.bf16 %v3816_v18, %v1426_v41 }
 0x2ff   :  { %v1549_v59 = vmax.bf16 %v3509_v0, %v1513_v43 }
 0x300   :  { %v1255_v52 = vpop.f32.mrb[56].mxu0  ;;  %v1376_v53 = vpop.f32.mrb[64].mxu1  ;;  %v1550_v55 = vmax.bf16 %v3509_v0, %v1514_v50  ;;  %2089 = vmatpush1.bf16.msra.mxu0 %v3371_v42  ;;  %v3388_v42 = vld [vmem:[#allocation7 + $0x1e4] ss:$8 sps:$4 sm:$0xff]  }
 0x301   :  { %v1257_v57 = vpop.f32.mrb[57].mxu0  ;;  %v1378_v58 = vpop.f32.mrb[65].mxu1  ;;  %2090 = vmatprep.subr.bf16.mxu0 %v3376_v47 }
 0x302   :  { %v1259_v60 = vpop.f32.mrb[58].mxu0  ;;  %v1380_v62 = vpop.f32.mrb[66].mxu1  ;;  %2031 = vmatprep.mubr.bf16.mxu0 %v1550_v55  ;;  %v3386_v55 = vld [vmem:[#allocation7 + $0x1e0] ss:$8 sps:$4 sm:$0xff]  }
 0x303   :  { %v1427_v63 = vpack.c.bf16 %v1259_v60, %v1255_v52  ;;  %v1429_v1 = vpack.c.bf16 %v1380_v62, %v1376_v53  ;;  %v1261_v2 = vpop.f32.mrb[59].mxu0  ;;  %v1382_v3 = vpop.f32.mrb[67].mxu1  ;;  %2032 = vmatmul.mubr.bf16.gmra.mrb[88].mxu0 %v1549_v59  ;;  %v3391_v60 = vld [vmem:[#allocation7 + $0x1f4] ss:$8 sps:$4 sm:$0xff]  }
 0x304   :  { %v1428_v4 = vpack.c.bf16 %v1261_v2, %v1257_v57  ;;  %v1430_v5 = vpack.c.bf16 %v1382_v3, %v1378_v58  ;;  %2091 = vmatpush1.bf16.msra.mxu0 %v3374_v56 }
 0x305   :  { %v1517_v7 = vadd.bf16 %v3807_v13, %v1427_v63  ;;  %v3922_v8 = vadd.bf16 %v3810_v14, %v1429_v1  ;;  %2092 = vmatprep.subr.bf16.mxu0 %v3379_v61 }
 0x306   :  { %v1518_v12 = vadd.bf16 %v3813_v17, %v1428_v4  ;;  %v3926_v15 = vadd.bf16 %v3816_v18, %v1430_v5 }
 0x307   :  { %v1553_v27 = vmax.bf16 %v3509_v0, %v1517_v7 }
 0x308   :  { %v1265_v20 = vpop.f32.mrb[60].mxu0  ;;  %v1386_v21 = vpop.f32.mrb[68].mxu1  ;;  %v1554_v22 = vmax.bf16 %v3509_v0, %v1518_v12  ;;  %2093 = vmatpush1.bf16.msra.mxu0 %v3377_v6  ;;  %v3389_v12 = vld [vmem:[#allocation7 + $0x1f0] ss:$8 sps:$4 sm:$0xff]  }
 0x309   :  { %v1267_v24 = vpop.f32.mrb[61].mxu0  ;;  %v1388_v25 = vpop.f32.mrb[69].mxu1  ;;  %2094 = vmatprep.subr.bf16.mxu0 %v3382_v9 }
 0x30a   :  { %v1269_v31 = vpop.f32.mrb[62].mxu0  ;;  %v1390_v32 = vpop.f32.mrb[70].mxu1  ;;  %2041 = vmatprep.mubr.bf16.mxu0 %v1554_v22  ;;  %v1540_v22 = vmax.bf16 %v3509_v0, %v3853_v16  ;;  %v1552_v16 = vmax.bf16 %v3509_v0, %v3916_v51 }
 0x30b   :  { %v1431_v33 = vpack.c.bf16 %v1269_v31, %v1265_v20  ;;  %v1433_v34 = vpack.c.bf16 %v1390_v32, %v1386_v21  ;;  %v1271_v35 = vpop.f32.mrb[63].mxu0  ;;  %v1392_v36 = vpop.f32.mrb[71].mxu1  ;;  %2042 = vmatmul.mubr.bf16.gmra.mrb[92].mxu0 %v1553_v27 }
 0x30c   :  { %v1432_v49 = vpack.c.bf16 %v1271_v35, %v1267_v24  ;;  %v1434_v37 = vpack.c.bf16 %v1392_v36, %v1388_v25  ;;  %2095 = vmatpush1.bf16.msra.mxu0 %v3380_v23  ;;  %v1544_v23 = vmax.bf16 %v3509_v0, %v3875_v46  ;;  %v1556_v46 = vmax.bf16 %v3509_v0, %v3926_v15  ;;  %v3406_v15 = vld [vmem:[%s4181_s9 + $0x78] sm:$0xff]   ;;  %v3005_v24 = vld.sshfl [vmem:[%s4180_s8] sm:$0x11 pattern:$0x75316420] }
 0x30d   :  { %v1521_v40 = vadd.bf16 %v3807_v13, %v1431_v33  ;;  %v3932_v41 = vadd.bf16 %v3810_v14, %v1433_v34  ;;  %2096 = vmatprep.subr.bf16.mxu0 %v3385_v29  ;;  %3037 = vmatprep.subr.bf16.mxu1 %v3406_v15  ;;  %v2218_v25 = vcombine.high %v3005_v24, %v3005_v24 }
 0x30e   :  { %v1522_v43 = vadd.bf16 %v3813_v17, %v1432_v49  ;;  %v1524_v47 = vadd.bf16 %v3816_v18, %v1434_v37  ;;  %v2225_v27 = vrot.slane %v3005_v24, %v3699_v30 }
 0x30f   :  { %v1557_v61 = vmax.bf16 %v3509_v0, %v1521_v40  ;;  %v2232_v29 = vrot.slane %v2218_v25, %v3699_v30 }
 0x310   :  { %v1275_v50 = vpop.f32.mrb[64].mxu0  ;;  %v1396_v52 = vpop.f32.mrb[72].mxu1  ;;  %v1558_v53 = vmax.bf16 %v3509_v0, %v1522_v43  ;;  %2097 = vmatpush1.bf16.msra.mxu0 %v3383_v38  ;;  %v2234_v31 = vpack.i.b16 %v2225_v27, %v2225_v27 }
 0x311   :  { %v1435_v56 = vpack.c.bf16 %v1275_v50, %v1275_v50  ;;  %v1437_v57 = vpack.c.bf16 %v1396_v52, %v1396_v52  ;;  %v1277_v58 = vpop.f32.mrb[65].mxu0  ;;  %v1398_v59 = vpop.f32.mrb[73].mxu1  ;;  %2098 = vmatprep.subr.bf16.mxu0 %v3388_v42  ;;  %v2241_v32 = vpack.i.b16 %v2232_v29, %v2232_v29 }
 0x312   :  { %v1436_v62 = vpack.c.bf16 %v1277_v58, %v1277_v58  ;;  %v1438_v63 = vpack.c.bf16 %v1398_v59, %v1398_v59  ;;  %v1279_v1 = vpop.f32.mrb[66].mxu0  ;;  %v1400_v2 = vpop.f32.mrb[74].mxu1  ;;  %2051 = vmatprep.mubr.bf16.mxu0 %v1558_v53  ;;  %v3989_v35 = vrot.slane %v2234_v31, %v3703_v39 }
 0x313   :  { %v1525_v3 = vadd.bf16 %v3807_v13, %v1435_v56  ;;  %v1527_v4 = vadd.bf16 %v3810_v14, %v1437_v57  ;;  %v1280_v5 = vpop.f32.mrb[67].mxu0  ;;  %v1401_v6 = vpop.f32.mrb[75].mxu1  ;;  %2052 = vmatmul.mubr.bf16.gmra.mrb[96].mxu0 %v1557_v61  ;;  %v1532_v13 = vmax.bf16 %v3509_v0, %v3824_v28  ;;  %v1531_v14 = vmax.bf16 %v3509_v0, %v3820_v26 }
 0x314   :  { %v1526_v7 = vadd.bf16 %v3813_v17, %v1436_v62  ;;  %v1528_v9 = vadd.bf16 %v3816_v18, %v1438_v63  ;;  %2099 = vmatpush1.bf16.msra.mxu0 %v3386_v55  ;;  %v1536_v17 = vmax.bf16 %v3509_v0, %v3834_v54  ;;  %v1535_v18 = vmax.bf16 %v3509_v0, %v3830_v48 }
 0x315   :  { %2100 = vmatprep.subr.bf16.mxu0 %v3391_v60  ;;  %v1561_v21 = vmax.bf16 %v3509_v0, %v1525_v3  ;;  %v1539_v28 = vmax.bf16 %v3509_v0, %v3849_v11  ;;  %v1543_v26 = vmax.bf16 %v3509_v0, %v3871_v44  ;;  %v1548_v54 = vmax.bf16 %v3509_v0, %v3897_v19 }
 0x316   :  { %v1562_v20 = vmax.bf16 %v3509_v0, %v1526_v7  ;;  %v1547_v48 = vmax.bf16 %v3509_v0, %v3893_v10  ;;  %v1551_v11 = vmax.bf16 %v3509_v0, %v3912_v45  ;;  %v1555_v44 = vmax.bf16 %v3509_v0, %v3922_v8  ;;  %v3407_v8 = vld [vmem:[%s4181_s9 + $0x38] sm:$0xff]  }
 0x317   :  { %v1560_v19 = vmax.bf16 %v3509_v0, %v1524_v47  ;;  %v1559_v10 = vmax.bf16 %v3509_v0, %v3932_v41  ;;  %v1564_v51 = vmax.bf16 %v3509_v0, %v1528_v9  ;;  %v1563_v45 = vmax.bf16 %v3509_v0, %v1527_v4  ;;  %3038 = vmatpush3.bf16.msra.mxu1 %v3407_v8 }
 0x318   :  { %2061 = vmatprep.mubr.bf16.mxu0 %v1562_v20  ;;  %2101 = vmatpush1.bf16.msra.mxu0 %v3389_v12  ;;  %v3992_v49 = vrot.slane %v2241_v32, %v3703_v39 }
 0x31b   :  { %2062 = vmatmul.mubr.bf16.gmra.mrb[100].mxu0 %v1561_v21 }
 0x31c   :  { %2102 = vmatprep.mubr.bf16.mxu0 %v1532_v13 }
 0x323   :  { %2103 = vmatmul.mubr.bf16.vlgmr.msra.gmra.mrb[68].mxu0 %v1531_v14 }
 0x324   :  { %2112 = vmatprep.mubr.bf16.mxu0 %v1536_v17 }
 0x32b   :  { %2113 = vmatmul.mubr.bf16.gmra.mrb[72].mxu0 %v1535_v18 }
 0x32c   :  { %2122 = vmatprep.mubr.bf16.mxu0 %v1540_v22 }
 0x333   :  { %2123 = vmatmul.mubr.bf16.gmra.mrb[76].mxu0 %v1539_v28 }
 0x334   :  { %2132 = vmatprep.mubr.bf16.mxu0 %v1544_v23 }
 0x33b   :  { %2133 = vmatmul.mubr.bf16.gmra.mrb[80].mxu0 %v1543_v26 }
 0x33c   :  { %2142 = vmatprep.mubr.bf16.mxu0 %v1548_v54 }
 0x343   :  { %2143 = vmatmul.mubr.bf16.gmra.mrb[84].mxu0 %v1547_v48 }
 0x344   :  { %2152 = vmatprep.mubr.bf16.mxu0 %v1552_v16 }
 0x34b   :  { %2153 = vmatmul.mubr.bf16.gmra.mrb[88].mxu0 %v1551_v11 }
 0x34c   :  { %2162 = vmatprep.mubr.bf16.mxu0 %v1556_v46 }
 0x353   :  { %2163 = vmatmul.mubr.bf16.gmra.mrb[92].mxu0 %v1555_v44 }
 0x354   :  { %2172 = vmatprep.mubr.bf16.mxu0 %v1560_v19 }
 0x35b   :  { %2173 = vmatmul.mubr.bf16.gmra.mrb[96].mxu0 %v1559_v10 }
 0x35c   :  { %2182 = vmatprep.mubr.bf16.mxu0 %v1564_v51 }
 0x363   :  { %2183 = vmatmul.mubr.bf16.gmra.mrb[100].mxu0 %v1563_v45 }
 0x3f6   :  { %v2104_v33 = vpop.f32.mrb[68].mxu0 }
 0x3f7   :  { %v2106_v34 = vpop.f32.mrb[69].mxu0 }
 0x3f8   :  { %v2108_v36 = vpop.f32.mrb[70].mxu0 }
 0x3f9   :  { %v2191_v37 = vpack.c.bf16 %v2108_v36, %v2104_v33  ;;  %v2110_v38 = vpop.f32.mrb[71].mxu0 }
 0x3fa   :  { %v2192_v40 = vpack.c.bf16 %v2110_v38, %v2106_v34 }
 0x3fb   :  { %v2247_v41 = vadd.bf16 %v3989_v35, %v2191_v37 }
 0x3fc   :  { %v2248_v42 = vadd.bf16 %v3992_v49, %v2192_v40 }
 0x3fd   :  { %v2265_v47 = vmax.bf16 %v3509_v0, %v2247_v41 }
 0x3fe   :  { %v2114_v43 = vpop.f32.mrb[72].mxu0  ;;  %v2266_v30 = vmax.bf16 %v3509_v0, %v2248_v42 }
 0x3ff   :  { %v2116_v50 = vpop.f32.mrb[73].mxu0 }
 0x400   :  { %v2118_v52 = vpop.f32.mrb[74].mxu0  ;;  %2450 = vmatprep.mubr.bf16.mxu1 %v2266_v30 }
 0x401   :  { %v2193_v53 = vpack.c.bf16 %v2118_v52, %v2114_v43  ;;  %v2120_v55 = vpop.f32.mrb[75].mxu0  ;;  %2451 = vmatmul.mubr.bf16.vlgmr.msra.gmra.mrb[76].mxu1 %v2265_v47 }
 0x402   :  { %v2194_v39 = vpack.c.bf16 %v2120_v55, %v2116_v50 }
 0x403   :  { %v2249_v56 = vadd.bf16 %v3989_v35, %v2193_v53 }
 0x404   :  { %v2250_v57 = vadd.bf16 %v3992_v49, %v2194_v39 }
 0x405   :  { %v2267_v60 = vmax.bf16 %v3509_v0, %v2249_v56 }
 0x406   :  { %v2124_v58 = vpop.f32.mrb[76].mxu0  ;;  %v2268_v59 = vmax.bf16 %v3509_v0, %v2250_v57 }
 0x407   :  { %v2126_v61 = vpop.f32.mrb[77].mxu0 }
 0x408   :  { %v2128_v62 = vpop.f32.mrb[78].mxu0  ;;  %2458 = vmatprep.mubr.bf16.mxu1 %v2268_v59 }
 0x409   :  { %v2195_v63 = vpack.c.bf16 %v2128_v62, %v2124_v58  ;;  %v2130_v1 = vpop.f32.mrb[79].mxu0  ;;  %2459 = vmatmul.mubr.bf16.gmra.mrb[80].mxu1 %v2267_v60 }
 0x40a   :  { %v2196_v2 = vpack.c.bf16 %v2130_v1, %v2126_v61 }
 0x40b   :  { %v2251_v3 = vadd.bf16 %v3989_v35, %v2195_v63 }
 0x40c   :  { %v2252_v4 = vadd.bf16 %v3992_v49, %v2196_v2 }
 0x40d   :  { %v2269_v9 = vmax.bf16 %v3509_v0, %v2251_v3 }
 0x40e   :  { %v2134_v5 = vpop.f32.mrb[80].mxu0  ;;  %v2270_v6 = vmax.bf16 %v3509_v0, %v2252_v4 }
 0x40f   :  { %v2136_v7 = vpop.f32.mrb[81].mxu0 }
 0x410   :  { %v2138_v12 = vpop.f32.mrb[82].mxu0  ;;  %2466 = vmatprep.mubr.bf16.mxu1 %v2270_v6  ;;  %v3511_v6 = vmov 45  }
 0x411   :  { %v2197_v20 = vpack.c.bf16 %v2138_v12, %v2134_v5  ;;  %v2140_v21 = vpop.f32.mrb[83].mxu0  ;;  %2467 = vmatmul.mubr.bf16.gmra.mrb[84].mxu1 %v2269_v9  ;;  %3144 = vset.pattern.permute.xlu1 %v3511_v6  ;;  %v4033_v9 = vld [vmem:[%s4182_s10] ss:$0 sm:$0xff]  ;;  %s3512_s10 = smov [#allocation8]  }
 0x412   :  { %v2198_v13 = vpack.c.bf16 %v2140_v21, %v2136_v7  ;;  %3145 = vset.pattern.permute.xlu0 %v3511_v6  ;;  %s2816_s28 = sshll.u32 %s3512_s10, 4  ;;  %s2817_s28 = int_to_ptr.vmem [resolvable:$true] %s2816_s28 }
 0x413   :  { %v2253_v14 = vadd.bf16 %v3989_v35, %v2197_v20  ;;  %s3474_s29 = scalar_lea.vmem %s2817_s28, 2176  ;;  %p3479_p11 = scmp.lt.s32.totalorder %s2817_s28, %s2817_s28 }
 0x414   :  { %v2254_v17 = vadd.bf16 %v3992_v49, %v2198_v13  ;;  %p3475_p10 = scmp.ne.s32.totalorder %s2817_s28, %s3474_s29  ;;  %p3480_p12 = scmp.lt.s32.totalorder %s3474_s29, %s3474_s29 }
 0x415   :  { %v2271_v23 = vmax.bf16 %v3509_v0, %v2253_v14 }
 0x416   :  { %v2144_v18 = vpop.f32.mrb[84].mxu0  ;;  %v2272_v22 = vmax.bf16 %v3509_v0, %v2254_v17  ;;  %p3481_p13 = por %p3480_p12, %p3479_p11 }
 0x417   :  { %v2146_v28 = vpop.f32.mrb[85].mxu0 }
 0x418   :  { %v2148_v26 = vpop.f32.mrb[86].mxu0  ;;  %2474 = vmatprep.mubr.bf16.mxu1 %v2272_v22  ;;  %p3482_p0 = pnand %p3481_p13, %p3475_p10 }
 0x419   :  { %v2199_v54 = vpack.c.bf16 %v2148_v26, %v2144_v18  ;;  %v2150_v48 = vpop.f32.mrb[87].mxu0  ;;  %2475 = vmatmul.mubr.bf16.gmra.mrb[88].mxu1 %v2271_v23 }
 0x41a   :  { %v2200_v16 = vpack.c.bf16 %v2150_v48, %v2146_v28 }
 0x41b   :  { %v2255_v11 = vadd.bf16 %v3989_v35, %v2199_v54 }
 0x41c   :  { %v2256_v46 = vadd.bf16 %v3992_v49, %v2200_v16 }
 0x41d   :  { %v2273_v51 = vmax.bf16 %v3509_v0, %v2255_v11 }
 0x41e   :  { %v2154_v44 = vpop.f32.mrb[88].mxu0  ;;  %v2274_v19 = vmax.bf16 %v3509_v0, %v2256_v46 }
 0x41f   :  { %v2156_v10 = vpop.f32.mrb[89].mxu0 }
 0x420   :  { %v2158_v45 = vpop.f32.mrb[90].mxu0  ;;  %2482 = vmatprep.mubr.bf16.mxu1 %v2274_v19 }
 0x421   :  { %v2201_v15 = vpack.c.bf16 %v2158_v45, %v2154_v44  ;;  %v2160_v8 = vpop.f32.mrb[91].mxu0  ;;  %2483 = vmatmul.mubr.bf16.gmra.mrb[92].mxu1 %v2273_v51 }
 0x422   :  { %v2202_v24 = vpack.c.bf16 %v2160_v8, %v2156_v10 }
 0x423   :  { %v2257_v25 = vadd.bf16 %v3989_v35, %v2201_v15 }
 0x424   :  { %v2258_v27 = vadd.bf16 %v3992_v49, %v2202_v24 }
 0x425   :  { %v2275_v33 = vmax.bf16 %v3509_v0, %v2257_v25 }
 0x426   :  { %v2164_v29 = vpop.f32.mrb[92].mxu0  ;;  %v2276_v31 = vmax.bf16 %v3509_v0, %v2258_v27 }
 0x427   :  { %v2166_v32 = vpop.f32.mrb[93].mxu0 }
 0x428   :  { %v2168_v34 = vpop.f32.mrb[94].mxu0  ;;  %2490 = vmatprep.mubr.bf16.mxu1 %v2276_v31 }
 0x429   :  { %v2203_v36 = vpack.c.bf16 %v2168_v34, %v2164_v29  ;;  %v2170_v37 = vpop.f32.mrb[95].mxu0  ;;  %2491 = vmatmul.mubr.bf16.gmra.mrb[96].mxu1 %v2275_v33 }
 0x42a   :  { %v2204_v38 = vpack.c.bf16 %v2170_v37, %v2166_v32 }
 0x42b   :  { %v2259_v40 = vadd.bf16 %v3989_v35, %v2203_v36 }
 0x42c   :  { %v2260_v41 = vadd.bf16 %v3992_v49, %v2204_v38 }
 0x42d   :  { %v2277_v47 = vmax.bf16 %v3509_v0, %v2259_v40 }
 0x42e   :  { %v2174_v42 = vpop.f32.mrb[96].mxu0  ;;  %v2278_v43 = vmax.bf16 %v3509_v0, %v2260_v41 }
 0x42f   :  { %v2176_v30 = vpop.f32.mrb[97].mxu0 }
 0x430   :  { %v2178_v50 = vpop.f32.mrb[98].mxu0  ;;  %2498 = vmatprep.mubr.bf16.mxu1 %v2278_v43 }
 0x431   :  { %v2205_v52 = vpack.c.bf16 %v2178_v50, %v2174_v42  ;;  %v2180_v53 = vpop.f32.mrb[99].mxu0  ;;  %2499 = vmatmul.mubr.bf16.gmra.mrb[100].mxu1 %v2277_v47 }
 0x432   :  { %v2206_v55 = vpack.c.bf16 %v2180_v53, %v2176_v30 }
 0x433   :  { %v2261_v39 = vadd.bf16 %v3989_v35, %v2205_v52 }
 0x434   :  { %v2262_v56 = vadd.bf16 %v3992_v49, %v2206_v55 }
 0x435   :  { %v2279_v60 = vmax.bf16 %v3509_v0, %v2261_v39 }
 0x436   :  { %v2184_v57 = vpop.f32.mrb[100].mxu0  ;;  %v2280_v58 = vmax.bf16 %v3509_v0, %v2262_v56 }
 0x437   :  { %v2207_v59 = vpack.c.bf16 %v2184_v57, %v2184_v57  ;;  %v2186_v61 = vpop.f32.mrb[101].mxu0 }
 0x438   :  { %v2208_v62 = vpack.c.bf16 %v2186_v61, %v2186_v61  ;;  %v2188_v63 = vpop.f32.mrb[102].mxu0  ;;  %2506 = vmatprep.mubr.bf16.mxu1 %v2280_v58 }
 0x439   :  { %v2263_v1 = vadd.bf16 %v3989_v35, %v2207_v59  ;;  %v2189_v2 = vpop.f32.mrb[103].mxu0  ;;  %2507 = vmatmul.mubr.bf16.gmra.mrb[104].mxu1 %v2279_v60 }
 0x43a   :  { %v2264_v3 = vadd.bf16 %v3992_v49, %v2208_v62 }
 0x43b   :  { %v2281_v5 = vmax.bf16 %v3509_v0, %v2263_v1 }
 0x43c   :  { %v2282_v4 = vmax.bf16 %v3509_v0, %v2264_v3 }
 0x43e   :  { %2514 = vmatprep.mubr.bf16.mxu1 %v2282_v4 }
 0x441   :  { %2515 = vmatmul.mubr.bf16.gmra.mrb[108].mxu1 %v2281_v5 }
 0x4d4   :  { %v3039_v7 = vpop.f32.mrb[76].mxu1 }
 0x4d5   :  { %v3040_v35 = vpop.f32.mrb[77].mxu1 }
 0x4d6   :  { %v3041_v12 = vadd.f32 %v3040_v35, %v3039_v7  ;;  %v3042_v20 = vpop.f32.mrb[78].mxu1 }
 0x4d7   :  { %v3043_v21 = vpop.f32.mrb[79].mxu1 }
 0x4d8   :  { %v4036_v49 = vadd.f32 %v3041_v12, %v4033_v9  ;;  %v3044_v13 = vadd.f32 %v3043_v21, %v3042_v20 }
 0x4da   :  { %2694 = vperm.xlu1 %3144, %v4036_v49   ;;  %2522 = vadd.xlane.f32.xlu0 %v4036_v49  ;;  %v4041_v0 = vadd.f32 %v3044_v13, %v4033_v9 }
 0x4dc   :  { %v3045_v14 = vpop.f32.mrb[80].mxu1 }
 0x4dd   :  { %v3046_v17 = vpop.f32.mrb[81].mxu1 }
 0x4de   :  { %v3047_v18 = vadd.f32 %v3046_v17, %v3045_v14  ;;  %v3048_v22 = vpop.f32.mrb[82].mxu1  ;;  %2524 = vadd.xlane.f32.xlu0 %v4041_v0 }
 0x4df   :  { %v3049_v28 = vpop.f32.mrb[83].mxu1 }
 0x4e0   :  { %v3050_v23 = vadd.f32 %v3049_v28, %v3048_v22  ;;  %v4057_v36 = vadd.f32 %v3047_v18, %v4033_v9 }
 0x4e2   :  { %v4061_v43 = vadd.f32 %v3050_v23, %v4033_v9 }
 0x4e4   :  { %v3051_v26 = vpop.f32.mrb[84].mxu1 }
 0x4e5   :  { %v3052_v54 = vpop.f32.mrb[85].mxu1 }
 0x4e6   :  { %v3053_v48 = vadd.f32 %v3052_v54, %v3051_v26  ;;  %v3054_v16 = vpop.f32.mrb[86].mxu1 }
 0x4e7   :  { %v3055_v11 = vpop.f32.mrb[87].mxu1 }
 0x4e8   :  { %v4045_v46 = vadd.f32 %v3053_v48, %v4033_v9  ;;  %v3056_v44 = vadd.f32 %v3055_v11, %v3054_v16 }
 0x4ea   :  { %2530 = vadd.xlane.f32.xlu0 %v4045_v46  ;;  %v4069_v50 = vadd.f32 %v3056_v44, %v4033_v9 }
 0x4ec   :  { %v3057_v19 = vpop.f32.mrb[88].mxu1 }
 0x4ed   :  { %v3058_v10 = vpop.f32.mrb[89].mxu1 }
 0x4ee   :  { %v3059_v51 = vadd.f32 %v3058_v10, %v3057_v19  ;;  %v3060_v45 = vpop.f32.mrb[90].mxu1 }
 0x4ef   :  { %v3061_v15 = vpop.f32.mrb[91].mxu1 }
 0x4f0   :  { %v4049_v8 = vadd.f32 %v3059_v51, %v4033_v9  ;;  %v3062_v24 = vadd.f32 %v3061_v15, %v3060_v45 }
 0x4f2   :  { %2534 = vadd.xlane.f32.xlu0 %v4049_v8  ;;  %v4073_v57 = vadd.f32 %v3062_v24, %v4033_v9 }
 0x4f4   :  { %v3063_v25 = vpop.f32.mrb[92].mxu1 }
 0x4f5   :  { %v3064_v27 = vpop.f32.mrb[93].mxu1 }
 0x4f6   :  { %v3065_v29 = vadd.f32 %v3064_v27, %v3063_v25  ;;  %v3066_v31 = vpop.f32.mrb[94].mxu1 }
 0x4f7   :  { %v3067_v32 = vpop.f32.mrb[95].mxu1 }
 0x4f8   :  { %v4053_v33 = vadd.f32 %v3065_v29, %v4033_v9  ;;  %v3068_v34 = vadd.f32 %v3067_v32, %v3066_v31 }
 0x4fa   :  { %2538 = vadd.xlane.f32.xlu0 %v4053_v33  ;;  %v4081_v61 = vadd.f32 %v3068_v34, %v4033_v9 }
 0x4fc   :  { %v3069_v37 = vpop.f32.mrb[96].mxu1 }
 0x4fd   :  { %v3070_v38 = vpop.f32.mrb[97].mxu1 }
 0x4fe   :  { %v3071_v40 = vadd.f32 %v3070_v38, %v3069_v37  ;;  %v3072_v41 = vpop.f32.mrb[98].mxu1  ;;  %2526 = vadd.xlane.f32.xlu1 %v4057_v36 }
 0x4ff   :  { %v3073_v42 = vpop.f32.mrb[99].mxu1 }
 0x500   :  { %v4064_v30 = vadd.f32 %v3071_v40, %v4033_v9  ;;  %v3074_v47 = vadd.f32 %v3073_v42, %v3072_v41 }
 0x502   :  { %2528 = vadd.xlane.f32.xlu1 %v4061_v43  ;;  %2542 = vadd.xlane.f32.xlu0 %v4064_v30  ;;  %v4085_v3 = vadd.f32 %v3074_v47, %v4033_v9 }
 0x504   :  { %v3075_v52 = vpop.f32.mrb[100].mxu1 }
 0x505   :  { %v3076_v53 = vpop.f32.mrb[101].mxu1 }
 0x506   :  { %v3077_v55 = vadd.f32 %v3076_v53, %v3075_v52  ;;  %v3078_v39 = vpop.f32.mrb[102].mxu1  ;;  %2532 = vadd.xlane.f32.xlu1 %v4069_v50 }
 0x507   :  { %v3079_v56 = vpop.f32.mrb[103].mxu1 }
 0x508   :  { %v4076_v58 = vadd.f32 %v3077_v55, %v4033_v9  ;;  %v3080_v59 = vadd.f32 %v3079_v56, %v3078_v39 }
 0x50a   :  { %2536 = vadd.xlane.f32.xlu1 %v4073_v57  ;;  %2546 = vadd.xlane.f32.xlu0 %v4076_v58  ;;  %v4096_v7 = vadd.f32 %v3080_v59, %v4033_v9 }
 0x50c   :  { %v3081_v60 = vpop.f32.mrb[104].mxu1 }
 0x50d   :  { %v3082_v62 = vpop.f32.mrb[105].mxu1 }
 0x50e   :  { %v3083_v63 = vadd.f32 %v3082_v62, %v3081_v60  ;;  %v3084_v1 = vpop.f32.mrb[106].mxu1  ;;  %2540 = vadd.xlane.f32.xlu1 %v4081_v61 }
 0x50f   :  { %v3085_v2 = vpop.f32.mrb[107].mxu1 }
 0x510   :  { %v4088_v4 = vadd.f32 %v3083_v63, %v4033_v9  ;;  %v3086_v5 = vadd.f32 %v3085_v2, %v3084_v1 }
 0x512   :  { %v4091_v6 = vadd.f32 %v3086_v5, %v4033_v9  ;;  %2544 = vadd.xlane.f32.xlu1 %v4085_v3  ;;  %2550 = vadd.xlane.f32.xlu0 %v4088_v4 }
 0x514   :  { %v3087_v35 = vpop.f32.mrb[108].mxu1 }
 0x515   :  { %v3088_v12 = vpop.f32.mrb[109].mxu1 }
 0x516   :  { %v3089_v20 = vadd.f32 %v3088_v12, %v3087_v35  ;;  %v3090_v21 = vpop.f32.mrb[110].mxu1  ;;  %2548 = vadd.xlane.f32.xlu1 %v4096_v7 }
 0x517   :  { %v3091_v13 = vpop.f32.mrb[111].mxu1 }
 0x518   :  { %v4100_v14 = vadd.f32 %v3089_v20, %v4033_v9 }
 0x51a   :  { %2552 = vadd.xlane.f32.xlu1 %v4091_v6  ;;  %2554 = vadd.xlane.f32.xlu0 %v4100_v14 }
 0x52b   :  { %2704 = vperm.xlu1 %3144, %v4057_v36  }
 0x52f   :  { %2714 = vperm.xlu1 %3144, %v4045_v46  }
 0x530   :  { %2699 = vperm.xlu0 %3145, %v4041_v0  }
 0x533   :  { %2724 = vperm.xlu1 %3144, %v4049_v8  }
 0x534   :  { %2709 = vperm.xlu0 %3145, %v4061_v43  }
 0x537   :  { %2734 = vperm.xlu1 %3144, %v4053_v33  }
 0x538   :  { %2719 = vperm.xlu0 %3145, %v4069_v50  }
 0x53b   :  { %2744 = vperm.xlu1 %3144, %v4064_v30  }
 0x53c   :  { %2729 = vperm.xlu0 %3145, %v4073_v57  }
 0x53f   :  { %2754 = vperm.xlu1 %3144, %v4076_v58  }
 0x540   :  { %2739 = vperm.xlu0 %3145, %v4081_v61  }
 0x543   :  { %2764 = vperm.xlu1 %3144, %v4088_v4  }
 0x544   :  { %2749 = vperm.xlu0 %3145, %v4085_v3  }
 0x548   :  { %2759 = vperm.xlu0 %3145, %v4096_v7  }
 0x559   :  { %v4120_v54 = vpop.permute.xlu1 %2694 }
 0x567   :  { %v2523_v9 = vpop.xlane.xlu0 %2522 }
 0x568   :  { %v2556_v17 = vsub.f32 %v2523_v9, %v4036_v49 }
 0x56a   :  { %v2573_v18 = vmul.f32 0.022222223, %v2556_v17 }
 0x56b   :  { %v2525_v22 = vpop.xlane.xlu0 %2524 }
 0x56c   :  { %v2557_v28 = vsub.f32 %v2525_v22, %v4041_v0  ;;  %2592 = vperm.xlu1 %3144, %v2573_v18  }
 0x56e   :  { %v2574_v23 = vmul.f32 0.022222223, %v2557_v28 }
 0x570   :  { %2597 = vperm.xlu0 %3145, %v2574_v23  }
 0x577   :  { %v2531_v26 = vpop.xlane.xlu0 %2530 }
 0x578   :  { %v2560_v24 = vsub.f32 %v2531_v26, %v4045_v46 }
 0x57a   :  { %v2577_v31 = vmul.f32 0.022222223, %v2560_v24 }
 0x57f   :  { %v2535_v48 = vpop.xlane.xlu0 %2534 }
 0x580   :  { %v2562_v40 = vsub.f32 %v2535_v48, %v4049_v8 }
 0x582   :  { %v2579_v52 = vmul.f32 0.022222223, %v2562_v40 }
 0x587   :  { %v2539_v16 = vpop.xlane.xlu0 %2538 }
 0x588   :  { %v2564_v56 = vsub.f32 %v2539_v16, %v4053_v33 }
 0x58a   :  { %v2581_v63 = vmul.f32 0.022222223, %v2564_v56 }
 0x58b   :  { %v2527_v11 = vpop.xlane.xlu1 %2526 }
 0x58c   :  { %v2558_v44 = vsub.f32 %v2527_v11, %v4057_v36 }
 0x58e   :  { %v2575_v19 = vmul.f32 0.022222223, %v2558_v44 }
 0x58f   :  { %v2529_v10 = vpop.xlane.xlu1 %2528  ;;  %v2543_v51 = vpop.xlane.xlu0 %2542 }
 0x590   :  { %v2559_v45 = vsub.f32 %v2529_v10, %v4061_v43  ;;  %v2566_v15 = vsub.f32 %v2543_v51, %v4064_v30  ;;  %2602 = vperm.xlu1 %3144, %v2575_v19  }
 0x592   :  { %v2576_v25 = vmul.f32 0.022222223, %v2559_v45  ;;  %v2583_v27 = vmul.f32 0.022222223, %v2566_v15 }
 0x593   :  { %v2533_v29 = vpop.xlane.xlu1 %2532 }
 0x594   :  { %2607 = vperm.xlu1 %3144, %v2576_v25   ;;  %2642 = vperm.xlu0 %3145, %v2583_v27   ;;  %v2561_v32 = vsub.f32 %v2533_v29, %v4069_v50 }
 0x596   :  { %v2578_v41 = vmul.f32 0.022222223, %v2561_v32 }
 0x597   :  { %v2537_v34 = vpop.xlane.xlu1 %2536  ;;  %v2547_v37 = vpop.xlane.xlu0 %2546 }
 0x598   :  { %v2568_v38 = vsub.f32 %v2547_v37, %v4076_v58  ;;  %2612 = vperm.xlu1 %3144, %v2577_v31   ;;  %v2563_v53 = vsub.f32 %v2537_v34, %v4073_v57 }
 0x59a   :  { %v2585_v42 = vmul.f32 0.022222223, %v2568_v38  ;;  %v2580_v59 = vmul.f32 0.022222223, %v2563_v53 }
 0x59b   :  { %v2541_v47 = vpop.xlane.xlu1 %2540 }
 0x59c   :  { %2617 = vperm.xlu1 %3144, %v2578_v41   ;;  %2652 = vperm.xlu0 %3145, %v2585_v42   ;;  %v2565_v1 = vsub.f32 %v2541_v47, %v4081_v61 }
 0x59e   :  { %v2582_v12 = vmul.f32 0.022222223, %v2565_v1 }
 0x59f   :  { %v2551_v55 = vpop.xlane.xlu0 %2550  ;;  %v2545_v62 = vpop.xlane.xlu1 %2544 }
 0x5a0   :  { %v2570_v39 = vsub.f32 %v2551_v55, %v4088_v4  ;;  %2622 = vperm.xlu1 %3144, %v2579_v52   ;;  %v2567_v20 = vsub.f32 %v2545_v62, %v4085_v3 }
 0x5a2   :  { %v2587_v60 = vmul.f32 0.022222223, %v2570_v39  ;;  %v2584_v13 = vmul.f32 0.022222223, %v2567_v20 }
 0x5a3   :  { %v2549_v35 = vpop.xlane.xlu1 %2548 }
 0x5a4   :  { %2627 = vperm.xlu1 %3144, %v2580_v59   ;;  %2662 = vperm.xlu0 %3145, %v2587_v60   ;;  %v2569_v9 = vsub.f32 %v2549_v35, %v4096_v7 }
 0x5a6   :  { %v2586_v18 = vmul.f32 0.022222223, %v2569_v9 }
 0x5a7   :  { %v2555_v2 = vpop.xlane.xlu0 %2554  ;;  %v2553_v17 = vpop.xlane.xlu1 %2552 }
 0x5a8   :  { %v2572_v5 = vsub.f32 %v2555_v2, %v4100_v14  ;;  %2632 = vperm.xlu1 %3144, %v2581_v63   ;;  %v2571_v22 = vsub.f32 %v2553_v17, %v4091_v6 }
 0x5aa   :  { %v2589_v21 = vmul.f32 0.022222223, %v2572_v5  ;;  %v2588_v28 = vmul.f32 0.022222223, %v2571_v22 }
 0x5ab   :  { %v2705_v23 = vpop.permute.xlu1 %2704 }
 0x5ac   :  { %2637 = vperm.xlu1 %3144, %v2582_v12   ;;  %2672 = vperm.xlu0 %3145, %v2589_v21  }
 0x5af   :  { %v2700_v26 = vpop.permute.xlu0 %2699  ;;  %v2715_v48 = vpop.permute.xlu1 %2714 }
 0x5b0   :  { %2647 = vperm.xlu1 %3144, %v2584_v13   ;;  %2769 = vperm.xlu0 %3145, %v4091_v6  }
 0x5b3   :  { %v2710_v16 = vpop.permute.xlu0 %2709  ;;  %v2725_v11 = vpop.permute.xlu1 %2724 }
 0x5b4   :  { %2657 = vperm.xlu1 %3144, %v2586_v18  }
 0x5b7   :  { %v2720_v44 = vpop.permute.xlu0 %2719  ;;  %v2735_v19 = vpop.permute.xlu1 %2734 }
 0x5b8   :  { %2667 = vperm.xlu1 %3144, %v2588_v28  }
 0x5bb   :  { %v2730_v10 = vpop.permute.xlu0 %2729  ;;  %v2745_v51 = vpop.permute.xlu1 %2744 }
 0x5bc   :  { %2774 = vperm.xlu1 %3144, %v4100_v14  }
 0x5bf   :  { %v2740_v45 = vpop.permute.xlu0 %2739  ;;  %v2755_v15 = vpop.permute.xlu1 %2754 }
 0x5c3   :  { %v2750_v24 = vpop.permute.xlu0 %2749  ;;  %v2765_v25 = vpop.permute.xlu1 %2764 }
 0x5c7   :  { %v2760_v27 = vpop.permute.xlu0 %2759 }
 0x5eb   :  { %v2593_v29 = vpop.permute.xlu1 %2592 }
 0x5ec   :  { %v2675_v31 = vsub.f32 %v4036_v49, %v2593_v29 }
 0x5ee   :  { %v2777_v32 = vadd.f32 %v4120_v54, %v2675_v31 }
 0x5ef   :  { %v2598_v34 = vpop.permute.xlu0 %2597 }
 0x5f0   :  { %2794 = vst [vmem:[#allocation8] sm:$0xff] %v2777_v32  ;;  %v2676_v37 = vsub.f32 %v4041_v0, %v2598_v34 }
 0x5f2   :  { %v2778_v38 = vadd.f32 %v2700_v26, %v2676_v37 }
 0x5f4   :  { %2795 = vst [vmem:[#allocation8 + $0x8] sm:$0xff] %v2778_v38 }
 0x60f   :  { %v2603_v40 = vpop.permute.xlu1 %2602 }
 0x610   :  { %v2677_v41 = vsub.f32 %v4057_v36, %v2603_v40 }
 0x612   :  { %v2779_v42 = vadd.f32 %v2705_v23, %v2677_v41 }
 0x613   :  { %v2608_v47 = vpop.permute.xlu1 %2607  ;;  %v2643_v52 = vpop.permute.xlu0 %2642 }
 0x614   :  { %2796 = vst [vmem:[#allocation8 + $0x10] sm:$0xff] %v2779_v42  ;;  %v2678_v53 = vsub.f32 %v4061_v43, %v2608_v47  ;;  %v2685_v55 = vsub.f32 %v4064_v30, %v2643_v52 }
 0x616   :  { %v2780_v49 = vadd.f32 %v2710_v16, %v2678_v53  ;;  %v2787_v39 = vadd.f32 %v2745_v51, %v2685_v55 }
 0x617   :  { %v2613_v54 = vpop.permute.xlu1 %2612 }
 0x618   :  { %2797 = vst [vmem:[#allocation8 + $0x18] sm:$0xff] %v2780_v49  ;;  %2804 = vst [vmem:[#allocation8 + $0x50] sm:$0xff] %v2787_v39  ;;  %v2679_v0 = vsub.f32 %v4045_v46, %v2613_v54 }
 0x61a   :  { %v2781_v56 = vadd.f32 %v2715_v48, %v2679_v0 }
 0x61b   :  { %v2618_v59 = vpop.permute.xlu1 %2617  ;;  %v2653_v60 = vpop.permute.xlu0 %2652 }
 0x61c   :  { %2798 = vst [vmem:[#allocation8 + $0x20] sm:$0xff] %v2781_v56  ;;  %v2680_v36 = vsub.f32 %v4069_v50, %v2618_v59  ;;  %v2687_v62 = vsub.f32 %v4076_v58, %v2653_v60 }
 0x61e   :  { %v2782_v63 = vadd.f32 %v2720_v44, %v2680_v36  ;;  %v2789_v1 = vadd.f32 %v2755_v15, %v2687_v62 }
 0x61f   :  { %v2623_v43 = vpop.permute.xlu1 %2622 }
 0x620   :  { %2799 = vst [vmem:[#allocation8 + $0x28] sm:$0xff] %v2782_v63  ;;  %2806 = vst [vmem:[#allocation8 + $0x60] sm:$0xff] %v2789_v1  ;;  %v2681_v30 = vsub.f32 %v4049_v8, %v2623_v43 }
 0x622   :  { %v2783_v2 = vadd.f32 %v2725_v11, %v2681_v30 }
 0x623   :  { %v2628_v5 = vpop.permute.xlu1 %2627  ;;  %v2663_v35 = vpop.permute.xlu0 %2662 }
 0x624   :  { %2800 = vst [vmem:[#allocation8 + $0x30] sm:$0xff] %v2783_v2  ;;  %v2682_v46 = vsub.f32 %v4073_v57, %v2628_v5  ;;  %v2689_v12 = vsub.f32 %v4088_v4, %v2663_v35 }
 0x626   :  { %v2784_v20 = vadd.f32 %v2730_v10, %v2682_v46  ;;  %v2791_v21 = vadd.f32 %v2765_v25, %v2689_v12 }
 0x627   :  { %v2633_v50 = vpop.permute.xlu1 %2632 }
 0x628   :  { %2801 = vst [vmem:[#allocation8 + $0x38] sm:$0xff] %v2784_v20  ;;  %2808 = vst [vmem:[#allocation8 + $0x70] sm:$0xff] %v2791_v21  ;;  %v2683_v58 = vsub.f32 %v4053_v33, %v2633_v50 }
 0x62a   :  { %v2785_v13 = vadd.f32 %v2735_v19, %v2683_v58 }
 0x62b   :  { %v2638_v9 = vpop.permute.xlu1 %2637  ;;  %v2673_v28 = vpop.permute.xlu0 %2672 }
 0x62c   :  { %2802 = vst [vmem:[#allocation8 + $0x40] sm:$0xff] %v2785_v13  ;;  %v2684_v8 = vsub.f32 %v4081_v61, %v2638_v9  ;;  %v2691_v61 = vsub.f32 %v4100_v14, %v2673_v28 }
 0x62e   :  { %v2786_v17 = vadd.f32 %v2740_v45, %v2684_v8 }
 0x62f   :  { %v2648_v18 = vpop.permute.xlu1 %2647  ;;  %v2770_v16 = vpop.permute.xlu0 %2769 }
 0x630   :  { %2803 = vst [vmem:[#allocation8 + $0x48] sm:$0xff] %v2786_v17  ;;  %v2686_v22 = vsub.f32 %v4085_v3, %v2648_v18 }
 0x632   :  { %v2788_v57 = vadd.f32 %v2750_v24, %v2686_v22 }
 0x633   :  { %v2658_v4 = vpop.permute.xlu1 %2657 }
 0x634   :  { %2805 = vst [vmem:[#allocation8 + $0x58] sm:$0xff] %v2788_v57  ;;  %v2688_v23 = vsub.f32 %v4096_v7, %v2658_v4 }
 0x636   :  { %v2790_v26 = vadd.f32 %v2760_v27, %v2688_v23 }
 0x637   :  { %v2668_v48 = vpop.permute.xlu1 %2667 }
 0x638   :  { %2807 = vst [vmem:[#allocation8 + $0x68] sm:$0xff] %v2790_v26  ;;  %v2690_v33 = vsub.f32 %v4091_v6, %v2668_v48 }
 0x63a   :  { %v2792_v11 = vadd.f32 %v2770_v16, %v2690_v33 }
 0x63b   :  { %v2775_v44 = vpop.permute.xlu1 %2774 }
 0x63c   :  { %2809 = vst [vmem:[#allocation8 + $0x78] sm:$0xff] %v2792_v11  ;;  %v2793_v3 = vadd.f32 %v2775_v44, %v2691_v61 }
 0x63e   :  { %2810 = vst [vmem:[#allocation8 + $0x80] sm:$0xff] %v2793_v3 }
 0x63f   :  { %3485 = shalt.err (!%p3482_p0)
}
 0x640   :  { %s3486_s12 = scalar_lea.hbm %s4183_s11, 2176 }
 0x641   :  { %p3487_p1 = scmp.ne.s32.totalorder %s4183_s11, %s3486_s12  ;;  %p3490_p2 = scmp.lt.u32.totalorder %s3486_s12, %s4183_s11 }
 0x643   :  { %p3492_p3 = pnand %p3490_p2, %p3487_p1 }
 0x645   :  { %3495 = shalt.err (!%p3492_p3)
}
 0x646   :  { %2822 = dma.vmem_to_hbm [thread:$0]  %s2817_s28, 2176, %s4183_s11, [#allocation4], %s3506_s5, %s3506_s5, %s3507_s18  }
 0x647   :  { %3500 = dma.done.wait [#allocation4], 2176  }
 0x648   :  { %3501 = vsyncadd [#allocation4], 4294965120 }
 0x649   :  { %2826 = vsyncpa [#allocation3], 1 }
 0x64a   :  { %2827 = vsyncpa [#allocation6], 1 }
 0x64b   :  { %2828 = vsyncpa [#allocation4], 1 }

</bundles_post_ra>
